<compile_context>
chip_gen: v5e
topology: v5e:2x2
jax: 0.10.0
libtpu: 0.0.40
codegen_flags: <defaults>
</compile_context>

<pallas_src>
import functools

import jax
import jax.numpy as jnp
from jax.experimental import pallas as pl
from jax.experimental.pallas import tpu as pltpu  # noqa: F401  (TPU backend)


FC_N = 128  # padded FC lane width


# ----------------------------- Pallas kernels -----------------------------

def _conv_relu_pool_kernel(p_ref, w_ref, b_ref, o_ref):
    """Fused valid-conv (as matmul) + bias + ReLU + 2x2/stride-2 max-pool.

    p_ref : (4, K, M)  im2col patches, one slab per pool quadrant (dy, dx);
                       K = Cin*k*k, M = B*Hp*Wp (pooled spatial = lane axis).
    w_ref : (Cout, K)  weight matrix (Cout padded for sublane alignment).
    b_ref : (Cout, 1)  bias column.
    o_ref : (Cout, M)  pooled, ReLU'd activations (lane-dense store).
    """
    w = w_ref[...]
    m0 = jnp.dot(w, p_ref[0], preferred_element_type=jnp.float32)
    m1 = jnp.dot(w, p_ref[1], preferred_element_type=jnp.float32)
    m2 = jnp.dot(w, p_ref[2], preferred_element_type=jnp.float32)
    m3 = jnp.dot(w, p_ref[3], preferred_element_type=jnp.float32)
    # pool(relu(conv + b)) == relu(max_q(conv_q) + b): bias is the same for all
    # quadrants and ReLU is monotone.
    y = jnp.maximum(jnp.maximum(m0, m1), jnp.maximum(m2, m3)) + b_ref[...]
    o_ref[...] = jnp.maximum(y, 0.0)


def _fc_stack_kernel(x_ref, w1_ref, w2_ref, w3_ref, b_ref, o_ref):
    """Fused fc1(+ReLU) -> fc2(+ReLU) -> fc3; intermediates stay in VMEM/vregs.

    x_ref: (B, 400); w1: (400, 128); w2, w3: (128, 128); b: (3, 128).
    All N dims zero-padded to 128 so every store is lane-dense.
    """
    h = jnp.dot(x_ref[...], w1_ref[...], preferred_element_type=jnp.float32)
    h = jnp.maximum(h + b_ref[0:1, :], 0.0)
    h = jnp.dot(h, w2_ref[...], preferred_element_type=jnp.float32)
    h = jnp.maximum(h + b_ref[1:2, :], 0.0)
    o_ref[...] = (jnp.dot(h, w3_ref[...], preferred_element_type=jnp.float32)
                  + b_ref[2:3, :])


# --------------------------- Pallas call wrappers --------------------------

def conv_relu_pool(x, w_mat, b_col, k):
    """x: (Cin, B, H, W) channels-major; w_mat: (Cout, Cin*k*k); b_col: (Cout,1).
    Returns ((Cout, B*Hp*Wp), Hp, Wp) with Hp = (H-k+1)//2, Wp = (W-k+1)//2."""
    C, B, H, W = x.shape
    Ho, Wo = H - k + 1, W - k + 1
    assert Ho % 2 == 0 and Wo % 2 == 0, "pool assumes even conv output dims"
    Hp, Wp = Ho // 2, Wo // 2

    # im2col grouped by 2x2 pool quadrant, columns already ordered (Cin, kh, kw)
    # to match the weight matrix, with (B, Hp, Wp) flattened on the lane axis.
    quads = []
    for dy in range(2):
        for dx in range(2):
            cols = []
            for kh in range(k):
                for kw in range(k):
                    hs, ws = dy + kh, dx + kw
                    cols.append(
                        x[:, :, hs:hs + 2 * Hp - 1:2, ws:ws + 2 * Wp - 1:2])
            p = jnp.stack(cols, axis=1)                  # (C, k*k, B, Hp, Wp)
            quads.append(p.reshape(C * k * k, B * Hp * Wp))
    patches = jnp.stack(quads, axis=0)                   # (4, K, M)

    Cout, K = w_mat.shape
    M = B * Hp * Wp
    out = pl.pallas_call(
        _conv_relu_pool_kernel,
        out_shape=jax.ShapeDtypeStruct((Cout, M), jnp.float32),
        in_specs=[pl.BlockSpec((4, K, M), lambda: (0, 0, 0)),
                  pl.BlockSpec((Cout, K), lambda: (0, 0)),
                  pl.BlockSpec((Cout, 1), lambda: (0, 0))],
        out_specs=pl.BlockSpec((Cout, M), lambda: (0, 0)),
    )(patches, w_mat, b_col)
    return out, Hp, Wp


def fc_stack(x, w1, w2, w3, b3x):
    B, K = x.shape
    N = w1.shape[1]
    return pl.pallas_call(
        _fc_stack_kernel,
        out_shape=jax.ShapeDtypeStruct((B, N), jnp.float32),
        in_specs=[pl.BlockSpec((B, K), lambda: (0, 0)),
                  pl.BlockSpec((K, N), lambda: (0, 0)),
                  pl.BlockSpec((N, N), lambda: (0, 0)),
                  pl.BlockSpec((N, N), lambda: (0, 0)),
                  pl.BlockSpec((3, N), lambda: (0, 0))],
        out_specs=pl.BlockSpec((B, N), lambda: (0, 0)),
    )(x, w1, w2, w3, b3x)


# ------------------------------ parameters ---------------------------------

def init_params(key):
    """PyTorch-default-like U(-1/sqrt(fan_in), 1/sqrt(fan_in)) init (raw shapes)."""
    def uniform(k, shape, fan_in):
        bound = 1.0 / float(fan_in) ** 0.5
        return jax.random.uniform(k, shape, jnp.float32, -bound, bound)
    ks = jax.random.split(key, 10)
    return {
        "conv1_w": uniform(ks[0], (6, 3, 5, 5), 3 * 25),
        "conv1_b": uniform(ks[1], (6,), 3 * 25),
        "conv2_w": uniform(ks[2], (16, 6, 5, 5), 6 * 25),
        "conv2_b": uniform(ks[3], (16,), 6 * 25),
        "fc1_w": uniform(ks[4], (400, 120), 400),
        "fc1_b": uniform(ks[5], (120,), 400),
        "fc2_w": uniform(ks[6], (120, 84), 120),
        "fc2_b": uniform(ks[7], (84,), 120),
        "fc3_w": uniform(ks[8], (84, 10), 84),
        "fc3_b": uniform(ks[9], (10,), 84),
    }


def prepare_params(raw):
    """One-time repack: conv weights -> (Cout, Cin*k*k) with Cout/Cin padded,
    FC weights zero-padded to N=128 for lane-dense stores. Padding is zeros so
    results are exact (padded channels / columns stay exactly zero)."""
    c1w = jnp.pad(raw["conv1_w"].reshape(6, 75), ((0, 2), (0, 0)))          # (8, 75)
    c1b = jnp.pad(raw["conv1_b"], (0, 2)).reshape(8, 1)
    # conv2 consumes conv1's 8 (= 6 real + 2 zero) channels -> pad Cin 6->8.
    c2w = jnp.pad(raw["conv2_w"], ((0, 0), (0, 2), (0, 0), (0, 0))).reshape(16, 200)
    c2b = raw["conv2_b"].reshape(16, 1)

    f1w = jnp.pad(raw["fc1_w"], ((0, 0), (0, FC_N - 120)))                  # (400,128)
    f2w = jnp.pad(raw["fc2_w"], ((0, FC_N - 120), (0, FC_N - 84)))          # (128,128)
    f3w = jnp.pad(raw["fc3_w"], ((0, FC_N - 84), (0, FC_N - 10)))           # (128,128)
    fb = jnp.stack([jnp.pad(raw["fc1_b"], (0, FC_N - 120)),
                    jnp.pad(raw["fc2_b"], (0, FC_N - 84)),
                    jnp.pad(raw["fc3_b"], (0, FC_N - 10))], axis=0)         # (3, 128)
    return {"conv1_w": c1w, "conv1_b": c1b, "conv2_w": c2w, "conv2_b": c2b,
            "fc1_w": f1w, "fc2_w": f2w, "fc3_w": f3w, "fc_b": fb}


# ------------------------------ forward pass --------------------------------

@functools.partial(jax.jit, static_argnums=(2,))
def net_forward(params, x, include):
    """x: (B, 3, 32, 32) float32 NCHW; include: static tuple of feature indices."""
    B = x.shape[0]
    xc = jnp.transpose(x, (1, 0, 2, 3))                    # channels-major (3,B,32,32)

    y1, hp1, wp1 = conv_relu_pool(xc, params["conv1_w"], params["conv1_b"], 5)
    y1 = y1.reshape(params["conv1_w"].shape[0], B, hp1, wp1)      # (8, B, 14, 14)

    y2, hp2, wp2 = conv_relu_pool(y1, params["conv2_w"], params["conv2_b"], 5)
    cout2 = params["conv2_w"].shape[0]                             # 16
    # (16, B*25) -> (B, 400) in torch.flatten(x, 1) order (c, h, w).
    feat = (y2.reshape(cout2, B, hp2 * wp2)
              .transpose(1, 0, 2)
              .reshape(B, cout2 * hp2 * wp2))

    w1 = params["fc1_w"]
    if len(include) > 0:
        # `include` semantics: keep listed features, zero the rest — folded
        # statically into fc1's weight rows instead of masking activations.
        mask = jnp.zeros((w1.shape[0], 1), jnp.float32)
        mask = mask.at[jnp.asarray(include), 0].set(1.0)
        w1 = w1 * mask

    out = fc_stack(feat, w1, params["fc2_w"], params["fc3_w"], params["fc_b"])
    return out[:, :10]


# ------------------------- pure-XLA reference check -------------------------

def reference_forward(raw, x, include):
    hi = jax.lax.Precision.HIGHEST
    dn = ("NCHW", "OIHW", "NCHW")

    def conv_relu(z, w, b):
        z = jax.lax.conv_general_dilated(z, w, (1, 1), "VALID",
                                         dimension_numbers=dn, precision=hi)
        return jax.nn.relu(z + b.reshape(1, -1, 1, 1))

    def pool(z):
        return jax.lax.reduce_window(z, -jnp.inf, jax.lax.max,
                                     (1, 1, 2, 2), (1, 1, 2, 2), "VALID")

    z = pool(conv_relu(x, raw["conv1_w"], raw["conv1_b"]))
    z = pool(conv_relu(z, raw["conv2_w"], raw["conv2_b"]))
    f = z.reshape(x.shape[0], -1)
    if len(include) > 0:
        m = jnp.zeros((f.shape[1],), jnp.float32).at[jnp.asarray(include)].set(1.0)
        f = f * m
    h = jax.nn.relu(jnp.dot(f, raw["fc1_w"], precision=hi) + raw["fc1_b"])
    h = jax.nn.relu(jnp.dot(h, raw["fc2_w"], precision=hi) + raw["fc2_b"])
    return jnp.dot(h, raw["fc3_w"], precision=hi) + raw["fc3_b"]


if __name__ == "__main__":
    key = jax.random.PRNGKey(0)
    pkey, xkey = jax.random.split(key)
    raw = init_params(pkey)
    params = prepare_params(raw)

    # Conv(5)->pool->Conv(5)->pool->16*5*5 flatten implies a 32x32 input.
    x = jax.random.normal(xkey, (2, 3, 32, 32), jnp.float32)
    include = (0, 3, 17, 42, 100, 256, 399)        # deterministic feature subset

    out = jax.block_until_ready(net_forward(params, x, include))
    assert out.shape == (2, 10) and out.dtype == jnp.float32
    ref = reference_forward(raw, x, include)
    assert jnp.allclose(out, ref, rtol=2e-2, atol=2e-2), \
        float(jnp.max(jnp.abs(out - ref)))

    # Also exercise the empty-`include` branch (unmasked pass-through).
    out2 = jax.block_until_ready(net_forward(params, x, ()))
    ref2 = reference_forward(raw, x, ())
    assert out2.shape == (2, 10)
    assert jnp.allclose(out2, ref2, rtol=2e-2, atol=2e-2), \
        float(jnp.max(jnp.abs(out2 - ref2)))

    print("KERNEL_OK")
</pallas_src>

<mosaic_0001>
module attributes {stable_mosaic.version = 11 : i64} {
  func.func @_conv_relu_pool_kernel(%arg0: memref<4x75x392xf32, #tpu.memory_space<vmem>>, %arg1: memref<8x75xf32, #tpu.memory_space<vmem>>, %arg2: memref<8x1xf32, #tpu.memory_space<vmem>>, %arg3: memref<8x392xf32, #tpu.memory_space<vmem>>) attributes {dimension_semantics = [], scalar_prefetch = 0 : i64, scratch_operands = 0 : i64, tpu.core_type = #tpu.core_type<tc>} {
    %c0 = arith.constant 0 : index
    %c0_0 = arith.constant 0 : index
    %0 = vector.load %arg1[%c0, %c0_0] : memref<8x75xf32, #tpu.memory_space<vmem>>, vector<8x75xf32>
    %c0_1 = arith.constant 0 : index
    %c0_2 = arith.constant 0 : index
    %c0_3 = arith.constant 0 : index
    %1 = vector.load %arg0[%c0_1, %c0_2, %c0_3] : memref<4x75x392xf32, #tpu.memory_space<vmem>>, vector<1x75x392xf32>
    %2 = vector.shape_cast %1 : vector<1x75x392xf32> to vector<75x392xf32>
    %cst = arith.constant dense<0.000000e+00> : vector<8x392xf32>
    %3 = tpu.matmul %0, %2, %cst {dimension_numbers = #tpu.dot_dimension_numbers<[1], [0], [0], [1], [0, 0, 1, 1], [], []>} : vector<8x75xf32>, vector<75x392xf32>, vector<8x392xf32> -> vector<8x392xf32>
    %c1 = arith.constant 1 : index
    %c0_4 = arith.constant 0 : index
    %c0_5 = arith.constant 0 : index
    %4 = vector.load %arg0[%c1, %c0_4, %c0_5] : memref<4x75x392xf32, #tpu.memory_space<vmem>>, vector<1x75x392xf32>
    %5 = vector.shape_cast %4 : vector<1x75x392xf32> to vector<75x392xf32>
    %cst_6 = arith.constant dense<0.000000e+00> : vector<8x392xf32>
    %6 = tpu.matmul %0, %5, %cst_6 {dimension_numbers = #tpu.dot_dimension_numbers<[1], [0], [0], [1], [0, 0, 1, 1], [], []>} : vector<8x75xf32>, vector<75x392xf32>, vector<8x392xf32> -> vector<8x392xf32>
    %c2 = arith.constant 2 : index
    %c0_7 = arith.constant 0 : index
    %c0_8 = arith.constant 0 : index
    %7 = vector.load %arg0[%c2, %c0_7, %c0_8] : memref<4x75x392xf32, #tpu.memory_space<vmem>>, vector<1x75x392xf32>
    %8 = vector.shape_cast %7 : vector<1x75x392xf32> to vector<75x392xf32>
    %cst_9 = arith.constant dense<0.000000e+00> : vector<8x392xf32>
    %9 = tpu.matmul %0, %8, %cst_9 {dimension_numbers = #tpu.dot_dimension_numbers<[1], [0], [0], [1], [0, 0, 1, 1], [], []>} : vector<8x75xf32>, vector<75x392xf32>, vector<8x392xf32> -> vector<8x392xf32>
    %c3 = arith.constant 3 : index
    %c0_10 = arith.constant 0 : index
    %c0_11 = arith.constant 0 : index
    %10 = vector.load %arg0[%c3, %c0_10, %c0_11] : memref<4x75x392xf32, #tpu.memory_space<vmem>>, vector<1x75x392xf32>
    %11 = vector.shape_cast %10 : vector<1x75x392xf32> to vector<75x392xf32>
    %cst_12 = arith.constant dense<0.000000e+00> : vector<8x392xf32>
    %12 = tpu.matmul %0, %11, %cst_12 {dimension_numbers = #tpu.dot_dimension_numbers<[1], [0], [0], [1], [0, 0, 1, 1], [], []>} : vector<8x75xf32>, vector<75x392xf32>, vector<8x392xf32> -> vector<8x392xf32>
    %13 = arith.maximumf %3, %6 : vector<8x392xf32>
    %14 = arith.maximumf %9, %12 : vector<8x392xf32>
    %15 = arith.maximumf %13, %14 : vector<8x392xf32>
    %c0_13 = arith.constant 0 : index
    %c0_14 = arith.constant 0 : index
    %16 = vector.load %arg2[%c0_13, %c0_14] : memref<8x1xf32, #tpu.memory_space<vmem>>, vector<8x1xf32>
    %17 = vector.broadcast %16 : vector<8x1xf32> to vector<8x392xf32>
    %18 = arith.addf %15, %17 : vector<8x392xf32>
    %cst_15 = arith.constant 0.000000e+00 : f32
    %19 = vector.broadcast %cst_15 : f32 to vector<8x392xf32>
    %20 = arith.maximumf %18, %19 : vector<8x392xf32>
    %c0_16 = arith.constant 0 : index
    %c0_17 = arith.constant 0 : index
    %21 = vector.load %arg3[%c0_16, %c0_17] : memref<8x392xf32, #tpu.memory_space<vmem>>, vector<8x392xf32>
    tpu.vector_store %arg3[%c0_16, %c0_17], %20 {strides = array<i32>} : memref<8x392xf32, #tpu.memory_space<vmem>>, vector<8x392xf32>,
    return
  }
}

module attributes {stable_mosaic.version = 11 : i64} {
  func.func @_conv_relu_pool_kernel(%arg0: memref<4x200x50xf32, #tpu.memory_space<vmem>>, %arg1: memref<16x200xf32, #tpu.memory_space<vmem>>, %arg2: memref<16x1xf32, #tpu.memory_space<vmem>>, %arg3: memref<16x50xf32, #tpu.memory_space<vmem>>) attributes {dimension_semantics = [], scalar_prefetch = 0 : i64, scratch_operands = 0 : i64, tpu.core_type = #tpu.core_type<tc>} {
    %c0 = arith.constant 0 : index
    %c0_0 = arith.constant 0 : index
    %0 = vector.load %arg1[%c0, %c0_0] : memref<16x200xf32, #tpu.memory_space<vmem>>, vector<16x200xf32>
    %c0_1 = arith.constant 0 : index
    %c0_2 = arith.constant 0 : index
    %c0_3 = arith.constant 0 : index
    %1 = vector.load %arg0[%c0_1, %c0_2, %c0_3] : memref<4x200x50xf32, #tpu.memory_space<vmem>>, vector<1x200x50xf32>
    %2 = vector.shape_cast %1 : vector<1x200x50xf32> to vector<200x50xf32>
    %cst = arith.constant dense<0.000000e+00> : vector<16x50xf32>
    %3 = tpu.matmul %0, %2, %cst {dimension_numbers = #tpu.dot_dimension_numbers<[1], [0], [0], [1], [0, 0, 1, 1], [], []>} : vector<16x200xf32>, vector<200x50xf32>, vector<16x50xf32> -> vector<16x50xf32>
    %c1 = arith.constant 1 : index
    %c0_4 = arith.constant 0 : index
    %c0_5 = arith.constant 0 : index
    %4 = vector.load %arg0[%c1, %c0_4, %c0_5] : memref<4x200x50xf32, #tpu.memory_space<vmem>>, vector<1x200x50xf32>
    %5 = vector.shape_cast %4 : vector<1x200x50xf32> to vector<200x50xf32>
    %cst_6 = arith.constant dense<0.000000e+00> : vector<16x50xf32>
    %6 = tpu.matmul %0, %5, %cst_6 {dimension_numbers = #tpu.dot_dimension_numbers<[1], [0], [0], [1], [0, 0, 1, 1], [], []>} : vector<16x200xf32>, vector<200x50xf32>, vector<16x50xf32> -> vector<16x50xf32>
    %c2 = arith.constant 2 : index
    %c0_7 = arith.constant 0 : index
    %c0_8 = arith.constant 0 : index
    %7 = vector.load %arg0[%c2, %c0_7, %c0_8] : memref<4x200x50xf32, #tpu.memory_space<vmem>>, vector<1x200x50xf32>
    %8 = vector.shape_cast %7 : vector<1x200x50xf32> to vector<200x50xf32>
    %cst_9 = arith.constant dense<0.000000e+00> : vector<16x50xf32>
    %9 = tpu.matmul %0, %8, %cst_9 {dimension_numbers = #tpu.dot_dimension_numbers<[1], [0], [0], [1], [0, 0, 1, 1], [], []>} : vector<16x200xf32>, vector<200x50xf32>, vector<16x50xf32> -> vector<16x50xf32>
    %c3 = arith.constant 3 : index
    %c0_10 = arith.constant 0 : index
    %c0_11 = arith.constant 0 : index
    %10 = vector.load %arg0[%c3, %c0_10, %c0_11] : memref<4x200x50xf32, #tpu.memory_space<vmem>>, vector<1x200x50xf32>
    %11 = vector.shape_cast %10 : vector<1x200x50xf32> to vector<200x50xf32>
    %cst_12 = arith.constant dense<0.000000e+00> : vector<16x50xf32>
    %12 = tpu.matmul %0, %11, %cst_12 {dimension_numbers = #tpu.dot_dimension_numbers<[1], [0], [0], [1], [0, 0, 1, 1], [], []>} : vector<16x200xf32>, vector<200x50xf32>, vector<16x50xf32> -> vector<16x50xf32>
    %13 = arith.maximumf %3, %6 : vector<16x50xf32>
    %14 = arith.maximumf %9, %12 : vector<16x50xf32>
    %15 = arith.maximumf %13, %14 : vector<16x50xf32>
    %c0_13 = arith.constant 0 : index
    %c0_14 = arith.constant 0 : index
    %16 = vector.load %arg2[%c0_13, %c0_14] : memref<16x1xf32, #tpu.memory_space<vmem>>, vector<16x1xf32>
    %17 = vector.broadcast %16 : vector<16x1xf32> to vector<16x50xf32>
    %18 = arith.addf %15, %17 : vector<16x50xf32>
    %cst_15 = arith.constant 0.000000e+00 : f32
    %19 = vector.broadcast %cst_15 : f32 to vector<16x50xf32>
    %20 = arith.maximumf %18, %19 : vector<16x50xf32>
    %c0_16 = arith.constant 0 : index
    %c0_17 = arith.constant 0 : index
    %21 = vector.load %arg3[%c0_16, %c0_17] : memref<16x50xf32, #tpu.memory_space<vmem>>, vector<16x50xf32>
    tpu.vector_store %arg3[%c0_16, %c0_17], %20 {strides = array<i32>} : memref<16x50xf32, #tpu.memory_space<vmem>>, vector<16x50xf32>,
    return
  }
}

module attributes {stable_mosaic.version = 11 : i64} {
  func.func @_fc_stack_kernel(%arg0: memref<2x400xf32, #tpu.memory_space<vmem>>, %arg1: memref<400x128xf32, #tpu.memory_space<vmem>>, %arg2: memref<128x128xf32, #tpu.memory_space<vmem>>, %arg3: memref<128x128xf32, #tpu.memory_space<vmem>>, %arg4: memref<3x128xf32, #tpu.memory_space<vmem>>, %arg5: memref<2x128xf32, #tpu.memory_space<vmem>>) attributes {dimension_semantics = [], scalar_prefetch = 0 : i64, scratch_operands = 0 : i64, tpu.core_type = #tpu.core_type<tc>} {
    %c0 = arith.constant 0 : index
    %c0_0 = arith.constant 0 : index
    %0 = vector.load %arg0[%c0, %c0_0] : memref<2x400xf32, #tpu.memory_space<vmem>>, vector<2x400xf32>
    %c0_1 = arith.constant 0 : index
    %c0_2 = arith.constant 0 : index
    %1 = vector.load %arg1[%c0_1, %c0_2] : memref<400x128xf32, #tpu.memory_space<vmem>>, vector<400x128xf32>
    %cst = arith.constant dense<0.000000e+00> : vector<2x128xf32>
    %2 = tpu.matmul %0, %1, %cst {dimension_numbers = #tpu.dot_dimension_numbers<[1], [0], [0], [1], [0, 0, 1, 1], [], []>} : vector<2x400xf32>, vector<400x128xf32>, vector<2x128xf32> -> vector<2x128xf32>
    %c0_3 = arith.constant 0 : index
    %c0_4 = arith.constant 0 : index
    %3 = vector.load %arg4[%c0_3, %c0_4] : memref<3x128xf32, #tpu.memory_space<vmem>>, vector<1x128xf32>
    %4 = vector.broadcast %3 : vector<1x128xf32> to vector<2x128xf32>
    %5 = arith.addf %2, %4 : vector<2x128xf32>
    %cst_5 = arith.constant 0.000000e+00 : f32
    %6 = vector.broadcast %cst_5 : f32 to vector<2x128xf32>
    %7 = arith.maximumf %5, %6 : vector<2x128xf32>
    %c0_6 = arith.constant 0 : index
    %c0_7 = arith.constant 0 : index
    %8 = vector.load %arg2[%c0_6, %c0_7] : memref<128x128xf32, #tpu.memory_space<vmem>>, vector<128x128xf32>
    %cst_8 = arith.constant dense<0.000000e+00> : vector<2x128xf32>
    %9 = tpu.matmul %7, %8, %cst_8 {dimension_numbers = #tpu.dot_dimension_numbers<[1], [0], [0], [1], [0, 0, 1, 1], [], []>} : vector<2x128xf32>, vector<128x128xf32>, vector<2x128xf32> -> vector<2x128xf32>
    %c1 = arith.constant 1 : index
    %c0_9 = arith.constant 0 : index
    %10 = vector.load %arg4[%c1, %c0_9] : memref<3x128xf32, #tpu.memory_space<vmem>>, vector<1x128xf32>
    %11 = vector.broadcast %10 : vector<1x128xf32> to vector<2x128xf32>
    %12 = arith.addf %9, %11 : vector<2x128xf32>
    %cst_10 = arith.constant 0.000000e+00 : f32
    %13 = vector.broadcast %cst_10 : f32 to vector<2x128xf32>
    %14 = arith.maximumf %12, %13 : vector<2x128xf32>
    %c0_11 = arith.constant 0 : index
    %c0_12 = arith.constant 0 : index
    %15 = vector.load %arg3[%c0_11, %c0_12] : memref<128x128xf32, #tpu.memory_space<vmem>>, vector<128x128xf32>
    %cst_13 = arith.constant dense<0.000000e+00> : vector<2x128xf32>
    %16 = tpu.matmul %14, %15, %cst_13 {dimension_numbers = #tpu.dot_dimension_numbers<[1], [0], [0], [1], [0, 0, 1, 1], [], []>} : vector<2x128xf32>, vector<128x128xf32>, vector<2x128xf32> -> vector<2x128xf32>
    %c2 = arith.constant 2 : index
    %c0_14 = arith.constant 0 : index
    %17 = vector.load %arg4[%c2, %c0_14] : memref<3x128xf32, #tpu.memory_space<vmem>>, vector<1x128xf32>
    %18 = vector.broadcast %17 : vector<1x128xf32> to vector<2x128xf32>
    %19 = arith.addf %16, %18 : vector<2x128xf32>
    %c0_15 = arith.constant 0 : index
    %c0_16 = arith.constant 0 : index
    %20 = vector.load %arg5[%c0_15, %c0_16] : memref<2x128xf32, #tpu.memory_space<vmem>>, vector<2x128xf32>
    tpu.vector_store %arg5[%c0_15, %c0_16], %19 {strides = array<i32>} : memref<2x128xf32, #tpu.memory_space<vmem>>, vector<2x128xf32>,
    return
  }
}

</mosaic_0001>

<bundles_post_ra>
// kernel: net_forward.3
= control target key start
LH: loop header
LB: loop body
LE: loop exit
PB: predicated region body
PF: predicated region fallthrough
CT: control target
= control target key end

     0   :  { %vm59_vm0 = vcmask 1042432   ;;  %vm55_vm1 = vcmask 613376   ;;  %vm580_vm2 = vcmask 64512   ;;  %s1309_s0 = inlined_call_operand.vmem [shape: f32[4,75,392], index: 0, kind: input, shape index: {}]   ;;  %s1310_s1 = inlined_call_operand.vmem [shape: f32[8,75], index: 1, kind: input, shape index: {}]   ;;  %s1311_s2 = inlined_call_operand.vmem [shape: f32[8,1], index: 2, kind: input, shape index: {}]   ;;  %s1312_s3 = inlined_call_operand.vmem [shape: f32[8,392], index: 3, kind: output, shape index: {}]  }
   0x1   :  { %v51_v0 = vld [vmem:[%s1309_s0 + $0x120] sm:$0x7]  ;;  %v52_v1 = vld [vmem:[%s1309_s0 + $0x128] sm:$0x7]  ;;  %v53_v2 = vld [vmem:[%s1309_s0 + $0x130] sm:$0x7] }
   0x2   :  { %586 = vmatpush.msk.msra.mxu0 %vm59_vm0, %v51_v0  ;;  %588 = vmatpush.msk.msra.mxu1 %vm59_vm0, %v52_v1  ;;  %v54_v3 = vld [vmem:[%s1309_s0 + $0x138] sm:$0x7]  ;;  %v47_v4 = vld [vmem:[%s1309_s0 + $0x100] sm:$0xff]  ;;  %v48_v5 = vld [vmem:[%s1309_s0 + $0x108] sm:$0xff] }
   0x3   :  { %590 = vmatpush.msk.msra.mxu2 %vm59_vm0, %v53_v2  ;;  %592 = vmatpush.msk.msra.mxu3 %vm59_vm0, %v54_v3  ;;  %v49_v6 = vld [vmem:[%s1309_s0 + $0x110] sm:$0xff]  ;;  %v50_v7 = vld [vmem:[%s1309_s0 + $0x118] sm:$0xff]  ;;  %v43_v8 = vld [vmem:[%s1309_s0 + $0xe0] sm:$0xff] }
   0x4   :  { %79 = vmatpush.msra.mxu0 %v47_v4  ;;  %99 = vmatpush.msra.mxu1 %v48_v5  ;;  %v44_v9 = vld [vmem:[%s1309_s0 + $0xe8] sm:$0xff]  ;;  %v45_v10 = vld [vmem:[%s1309_s0 + $0xf0] sm:$0xff]  ;;  %v46_v11 = vld [vmem:[%s1309_s0 + $0xf8] sm:$0xff] }
   0x5   :  { %119 = vmatpush.msra.mxu2 %v49_v6  ;;  %139 = vmatpush.msra.mxu3 %v50_v7  ;;  %v39_v12 = vld [vmem:[%s1309_s0 + $0xc0] sm:$0xff]  ;;  %v40_v13 = vld [vmem:[%s1309_s0 + $0xc8] sm:$0xff]  ;;  %v41_v14 = vld [vmem:[%s1309_s0 + $0xd0] sm:$0xff] }
   0x6   :  { %80 = vmatpush.msra.mxu0 %v43_v8  ;;  %100 = vmatpush.msra.mxu1 %v44_v9  ;;  %v42_v15 = vld [vmem:[%s1309_s0 + $0xd8] sm:$0xff]  ;;  %v35_v16 = vld [vmem:[%s1309_s0 + $0xa0] sm:$0xff]  ;;  %v36_v17 = vld [vmem:[%s1309_s0 + $0xa8] sm:$0xff] }
   0x7   :  { %120 = vmatpush.msra.mxu2 %v45_v10  ;;  %140 = vmatpush.msra.mxu3 %v46_v11  ;;  %v37_v18 = vld [vmem:[%s1309_s0 + $0xb0] sm:$0xff]  ;;  %v38_v19 = vld [vmem:[%s1309_s0 + $0xb8] sm:$0xff]  ;;  %v31_v20 = vld [vmem:[%s1309_s0 + $0x80] sm:$0xff] }
   0x8   :  { %81 = vmatpush.msra.mxu0 %v39_v12  ;;  %101 = vmatpush.msra.mxu1 %v40_v13  ;;  %v32_v21 = vld [vmem:[%s1309_s0 + $0x88] sm:$0xff]  ;;  %v33_v22 = vld [vmem:[%s1309_s0 + $0x90] sm:$0xff]  ;;  %v34_v23 = vld [vmem:[%s1309_s0 + $0x98] sm:$0xff] }
   0x9   :  { %121 = vmatpush.msra.mxu2 %v41_v14  ;;  %141 = vmatpush.msra.mxu3 %v42_v15  ;;  %v27_v24 = vld [vmem:[%s1309_s0 + $0x60] sm:$0xff]  ;;  %v28_v25 = vld [vmem:[%s1309_s0 + $0x68] sm:$0xff]  ;;  %v29_v26 = vld [vmem:[%s1309_s0 + $0x70] sm:$0xff] }
   0xa   :  { %82 = vmatpush.msra.mxu0 %v35_v16  ;;  %102 = vmatpush.msra.mxu1 %v36_v17  ;;  %v30_v27 = vld [vmem:[%s1309_s0 + $0x78] sm:$0xff]  ;;  %v23_v28 = vld [vmem:[%s1309_s0 + $0x40] sm:$0xff]  ;;  %v24_v29 = vld [vmem:[%s1309_s0 + $0x48] sm:$0xff] }
   0xb   :  { %122 = vmatpush.msra.mxu2 %v37_v18  ;;  %142 = vmatpush.msra.mxu3 %v38_v19  ;;  %v25_v30 = vld [vmem:[%s1309_s0 + $0x50] sm:$0xff]  ;;  %v26_v31 = vld [vmem:[%s1309_s0 + $0x58] sm:$0xff]  ;;  %v19_v32 = vld [vmem:[%s1309_s0 + $0x20] sm:$0xff] }
   0xc   :  { %83 = vmatpush.msra.mxu0 %v31_v20  ;;  %103 = vmatpush.msra.mxu1 %v32_v21  ;;  %v20_v33 = vld [vmem:[%s1309_s0 + $0x28] sm:$0xff]  ;;  %v21_v34 = vld [vmem:[%s1309_s0 + $0x30] sm:$0xff]  ;;  %v22_v35 = vld [vmem:[%s1309_s0 + $0x38] sm:$0xff] }
   0xd   :  { %123 = vmatpush.msra.mxu2 %v33_v22  ;;  %143 = vmatpush.msra.mxu3 %v34_v23  ;;  %v15_v36 = vld [vmem:[%s1309_s0] sm:$0xff]  ;;  %v16_v37 = vld [vmem:[%s1309_s0 + $0x8] sm:$0xff]  ;;  %v17_v38 = vld [vmem:[%s1309_s0 + $0x10] sm:$0xff] }
   0xe   :  { %84 = vmatpush.msra.mxu0 %v27_v24  ;;  %104 = vmatpush.msra.mxu1 %v28_v25  ;;  %v18_v39 = vld [vmem:[%s1309_s0 + $0x18] sm:$0xff]  ;;  %v630_v40 = vld [vmem:[%s1309_s0 + $0x260] sm:$0x7]  ;;  %v631_v41 = vld [vmem:[%s1309_s0 + $0x268] sm:$0x7] }
   0xf   :  { %124 = vmatpush.msra.mxu2 %v29_v26  ;;  %144 = vmatpush.msra.mxu3 %v30_v27  ;;  %v632_v42 = vld [vmem:[%s1309_s0 + $0x270] sm:$0x7]  ;;  %v633_v43 = vld [vmem:[%s1309_s0 + $0x278] sm:$0x7]  ;;  %v626_v44 = vld [vmem:[%s1309_s0 + $0x240] sm:$0xff] }
  0x10   :  { %85 = vmatpush.msra.mxu0 %v23_v28  ;;  %105 = vmatpush.msra.mxu1 %v24_v29  ;;  %v627_v45 = vld [vmem:[%s1309_s0 + $0x248] sm:$0xff]  ;;  %v628_v46 = vld [vmem:[%s1309_s0 + $0x250] sm:$0xff]  ;;  %v629_v47 = vld [vmem:[%s1309_s0 + $0x258] sm:$0xff] }
  0x11   :  { %125 = vmatpush.msra.mxu2 %v25_v30  ;;  %145 = vmatpush.msra.mxu3 %v26_v31  ;;  %v622_v48 = vld [vmem:[%s1309_s0 + $0x220] sm:$0xff]  ;;  %v623_v49 = vld [vmem:[%s1309_s0 + $0x228] sm:$0xff]  ;;  %v624_v50 = vld [vmem:[%s1309_s0 + $0x230] sm:$0xff] }
  0x12   :  { %86 = vmatpush.msra.mxu0 %v19_v32  ;;  %106 = vmatpush.msra.mxu1 %v20_v33  ;;  %v625_v51 = vld [vmem:[%s1309_s0 + $0x238] sm:$0xff]  ;;  %v618_v52 = vld [vmem:[%s1309_s0 + $0x200] sm:$0xff]  ;;  %v619_v53 = vld [vmem:[%s1309_s0 + $0x208] sm:$0xff] }
  0x13   :  { %126 = vmatpush.msra.mxu2 %v21_v34  ;;  %146 = vmatpush.msra.mxu3 %v22_v35  ;;  %v620_v54 = vld [vmem:[%s1309_s0 + $0x210] sm:$0xff]  ;;  %v621_v55 = vld [vmem:[%s1309_s0 + $0x218] sm:$0xff]  ;;  %v614_v56 = vld [vmem:[%s1309_s0 + $0x1e0] sm:$0xff] }
  0x14   :  { %87 = vmatpush.msra.mxu0 %v15_v36  ;;  %107 = vmatpush.msra.mxu1 %v16_v37  ;;  %v615_v57 = vld [vmem:[%s1309_s0 + $0x1e8] sm:$0xff]  ;;  %v616_v58 = vld [vmem:[%s1309_s0 + $0x1f0] sm:$0xff]  ;;  %v617_v59 = vld [vmem:[%s1309_s0 + $0x1f8] sm:$0xff] }
  0x15   :  { %127 = vmatpush.msra.mxu2 %v17_v38  ;;  %147 = vmatpush.msra.mxu3 %v18_v39  ;;  %v610_v60 = vld [vmem:[%s1309_s0 + $0x1c0] sm:$0xff]  ;;  %v611_v61 = vld [vmem:[%s1309_s0 + $0x1c8] sm:$0xff]  ;;  %v612_v62 = vld [vmem:[%s1309_s0 + $0x1d0] sm:$0xff] }
  0x16   :  { %634 = vmatpush.msk.msrb.mxu0 %vm59_vm0, %v630_v40  ;;  %636 = vmatpush.msk.msrb.mxu1 %vm59_vm0, %v631_v41  ;;  %v613_v63 = vld [vmem:[%s1309_s0 + $0x1d8] sm:$0xff]  ;;  %v964_v0 = vld [vmem:[%s1310_s1] sm:$0xff]  ;;  %v607_v2 = vld [vmem:[%s1309_s0 + $0x1a8] sm:$0xff] }
  0x17   :  { %638 = vmatpush.msk.msrb.mxu2 %vm59_vm0, %v632_v42  ;;  %640 = vmatpush.msk.msrb.mxu3 %vm59_vm0, %v633_v43  ;;  %v606_v1 = vld [vmem:[%s1309_s0 + $0x1a0] sm:$0xff]  ;;  %v608_v3 = vld [vmem:[%s1309_s0 + $0x1b0] sm:$0xff]  ;;  %v609_v4 = vld [vmem:[%s1309_s0 + $0x1b8] sm:$0xff] }
  0x18   :  { %212 = vmatpush.msrb.mxu0 %v626_v44  ;;  %232 = vmatpush.msrb.mxu1 %v627_v45  ;;  %v602_v5 = vld [vmem:[%s1309_s0 + $0x180] sm:$0xff]  ;;  %v603_v6 = vld [vmem:[%s1309_s0 + $0x188] sm:$0xff]  ;;  %v604_v7 = vld [vmem:[%s1309_s0 + $0x190] sm:$0xff] }
  0x19   :  { %252 = vmatpush.msrb.mxu2 %v628_v46  ;;  %272 = vmatpush.msrb.mxu3 %v629_v47  ;;  %v605_v8 = vld [vmem:[%s1309_s0 + $0x198] sm:$0xff]  ;;  %v598_v9 = vld [vmem:[%s1309_s0 + $0x160] sm:$0xff]  ;;  %v599_v10 = vld [vmem:[%s1309_s0 + $0x168] sm:$0xff] }
  0x1a   :  { %213 = vmatpush.msrb.mxu0 %v622_v48  ;;  %233 = vmatpush.msrb.mxu1 %v623_v49  ;;  %v600_v11 = vld [vmem:[%s1309_s0 + $0x170] sm:$0xff]  ;;  %v601_v12 = vld [vmem:[%s1309_s0 + $0x178] sm:$0xff]  ;;  %v594_v13 = vld [vmem:[%s1309_s0 + $0x140] sm:$0xff] }
  0x1b   :  { %253 = vmatpush.msrb.mxu2 %v624_v50  ;;  %273 = vmatpush.msrb.mxu3 %v625_v51  ;;  %v595_v14 = vld [vmem:[%s1309_s0 + $0x148] sm:$0xff]  ;;  %v596_v15 = vld [vmem:[%s1309_s0 + $0x150] sm:$0xff]  ;;  %v597_v16 = vld [vmem:[%s1309_s0 + $0x158] sm:$0xff] }
  0x1c   :  { %214 = vmatpush.msrb.mxu0 %v618_v52  ;;  %234 = vmatpush.msrb.mxu1 %v619_v53  ;;  %v678_v17 = vld [vmem:[%s1309_s0 + $0x3a0] sm:$0x7]  ;;  %v679_v18 = vld [vmem:[%s1309_s0 + $0x3a8] sm:$0x7]  ;;  %v680_v19 = vld [vmem:[%s1309_s0 + $0x3b0] sm:$0x7] }
  0x1d   :  { %254 = vmatpush.msrb.mxu2 %v620_v54  ;;  %274 = vmatpush.msrb.mxu3 %v621_v55  ;;  %v681_v20 = vld [vmem:[%s1309_s0 + $0x3b8] sm:$0x7]  ;;  %v674_v21 = vld [vmem:[%s1309_s0 + $0x380] sm:$0xff]  ;;  %v675_v22 = vld [vmem:[%s1309_s0 + $0x388] sm:$0xff] }
  0x1e   :  { %215 = vmatpush.msrb.mxu0 %v614_v56  ;;  %235 = vmatpush.msrb.mxu1 %v615_v57  ;;  %v676_v23 = vld [vmem:[%s1309_s0 + $0x390] sm:$0xff]  ;;  %v677_v24 = vld [vmem:[%s1309_s0 + $0x398] sm:$0xff]  ;;  %v670_v25 = vld [vmem:[%s1309_s0 + $0x360] sm:$0xff] }
  0x1f   :  { %255 = vmatpush.msrb.mxu2 %v616_v58  ;;  %275 = vmatpush.msrb.mxu3 %v617_v59  ;;  %v671_v26 = vld [vmem:[%s1309_s0 + $0x368] sm:$0xff]  ;;  %v672_v27 = vld [vmem:[%s1309_s0 + $0x370] sm:$0xff]  ;;  %v673_v28 = vld [vmem:[%s1309_s0 + $0x378] sm:$0xff] }
  0x20   :  { %216 = vmatpush.msrb.mxu0 %v610_v60  ;;  %236 = vmatpush.msrb.mxu1 %v611_v61  ;;  %v666_v29 = vld [vmem:[%s1309_s0 + $0x340] sm:$0xff]  ;;  %v667_v30 = vld [vmem:[%s1309_s0 + $0x348] sm:$0xff]  ;;  %v668_v31 = vld [vmem:[%s1309_s0 + $0x350] sm:$0xff] }
  0x21   :  { %256 = vmatpush.msrb.mxu2 %v612_v62  ;;  %276 = vmatpush.msrb.mxu3 %v613_v63  ;;  %v669_v32 = vld [vmem:[%s1309_s0 + $0x358] sm:$0xff]  ;;  %v662_v33 = vld [vmem:[%s1309_s0 + $0x320] sm:$0xff]  ;;  %v663_v34 = vld [vmem:[%s1309_s0 + $0x328] sm:$0xff] }
  0x22   :  { %591 = vmatmul.msk.f32.vlgmr.msra.gmra.mxu2 %vm55_vm1, %v964_v0  ;;  %593 = vmatmul.msk.f32.vlgmr.msra.gmra.mxu3 %vm55_vm1, %v964_v0  ;;  %v664_v35 = vld [vmem:[%s1309_s0 + $0x330] sm:$0xff]  ;;  %v665_v36 = vld [vmem:[%s1309_s0 + $0x338] sm:$0xff]  ;;  %v658_v37 = vld [vmem:[%s1309_s0 + $0x300] sm:$0xff] }
  0x23   :  { %217 = vmatpush.msrb.mxu0 %v606_v1  ;;  %237 = vmatpush.msrb.mxu1 %v607_v2  ;;  %v659_v38 = vld [vmem:[%s1309_s0 + $0x308] sm:$0xff]  ;;  %v660_v39 = vld [vmem:[%s1309_s0 + $0x310] sm:$0xff]  ;;  %v661_v40 = vld [vmem:[%s1309_s0 + $0x318] sm:$0xff] }
  0x24   :  { %257 = vmatpush.msrb.mxu2 %v608_v3  ;;  %277 = vmatpush.msrb.mxu3 %v609_v4  ;;  %v654_v41 = vld [vmem:[%s1309_s0 + $0x2e0] sm:$0xff]  ;;  %v655_v42 = vld [vmem:[%s1309_s0 + $0x2e8] sm:$0xff]  ;;  %v656_v43 = vld [vmem:[%s1309_s0 + $0x2f0] sm:$0xff] }
  0x25   :  { %218 = vmatpush.msrb.mxu0 %v602_v5  ;;  %238 = vmatpush.msrb.mxu1 %v603_v6  ;;  %v657_v44 = vld [vmem:[%s1309_s0 + $0x2f8] sm:$0xff]  ;;  %v650_v45 = vld [vmem:[%s1309_s0 + $0x2c0] sm:$0xff]  ;;  %v651_v46 = vld [vmem:[%s1309_s0 + $0x2c8] sm:$0xff] }
  0x26   :  { %258 = vmatpush.msrb.mxu2 %v604_v7  ;;  %278 = vmatpush.msrb.mxu3 %v605_v8  ;;  %v652_v47 = vld [vmem:[%s1309_s0 + $0x2d0] sm:$0xff]  ;;  %v653_v48 = vld [vmem:[%s1309_s0 + $0x2d8] sm:$0xff]  ;;  %v646_v49 = vld [vmem:[%s1309_s0 + $0x2a0] sm:$0xff] }
  0x27   :  { %219 = vmatpush.msrb.mxu0 %v598_v9  ;;  %239 = vmatpush.msrb.mxu1 %v599_v10  ;;  %v647_v50 = vld [vmem:[%s1309_s0 + $0x2a8] sm:$0xff]  ;;  %v648_v51 = vld [vmem:[%s1309_s0 + $0x2b0] sm:$0xff]  ;;  %v649_v52 = vld [vmem:[%s1309_s0 + $0x2b8] sm:$0xff] }
  0x28   :  { %259 = vmatpush.msrb.mxu2 %v600_v11  ;;  %279 = vmatpush.msrb.mxu3 %v601_v12  ;;  %v642_v53 = vld [vmem:[%s1309_s0 + $0x280] sm:$0xff]  ;;  %v643_v54 = vld [vmem:[%s1309_s0 + $0x288] sm:$0xff]  ;;  %v644_v55 = vld [vmem:[%s1309_s0 + $0x290] sm:$0xff] }
  0x29   :  { %587 = vmatmul.msk.f32.vlgmr.msra.gmra.mxu0 %vm55_vm1, %v964_v0  ;;  %589 = vmatmul.msk.f32.vlgmr.msra.gmra.mxu1 %vm55_vm1, %v964_v0  ;;  %v645_v56 = vld [vmem:[%s1309_s0 + $0x298] sm:$0xff]  ;;  %v726_v57 = vld [vmem:[%s1309_s0 + $0x4e0] sm:$0x7]  ;;  %v727_v58 = vld [vmem:[%s1309_s0 + $0x4e8] sm:$0x7] }
  0x2a   :  { %220 = vmatpush.msrb.mxu0 %v594_v13  ;;  %240 = vmatpush.msrb.mxu1 %v595_v14  ;;  %v728_v59 = vld [vmem:[%s1309_s0 + $0x4f0] sm:$0x7]  ;;  %v729_v60 = vld [vmem:[%s1309_s0 + $0x4f8] sm:$0x7]  ;;  %v722_v61 = vld [vmem:[%s1309_s0 + $0x4c0] sm:$0xff] }
  0x2b   :  { %260 = vmatpush.msrb.mxu2 %v596_v15  ;;  %280 = vmatpush.msrb.mxu3 %v597_v16  ;;  %v723_v62 = vld [vmem:[%s1309_s0 + $0x4c8] sm:$0xff]  ;;  %v724_v63 = vld [vmem:[%s1309_s0 + $0x4d0] sm:$0xff]  ;;  %v725_v1 = vld [vmem:[%s1309_s0 + $0x4d8] sm:$0xff] }
  0x2c   :  { %639 = vmatmul.msk.f32.vlgmr.msrb.gmra.mxu2 %vm55_vm1, %v964_v0  ;;  %641 = vmatmul.msk.f32.vlgmr.msrb.gmra.mxu3 %vm55_vm1, %v964_v0  ;;  %v718_v2 = vld [vmem:[%s1309_s0 + $0x4a0] sm:$0xff]  ;;  %v719_v3 = vld [vmem:[%s1309_s0 + $0x4a8] sm:$0xff]  ;;  %v720_v4 = vld [vmem:[%s1309_s0 + $0x4b0] sm:$0xff] }
  0x2d   :  { %682 = vmatpush.msk.msra.mxu0 %vm59_vm0, %v678_v17  ;;  %684 = vmatpush.msk.msra.mxu1 %vm59_vm0, %v679_v18  ;;  %v721_v5 = vld [vmem:[%s1309_s0 + $0x4b8] sm:$0xff]  ;;  %v714_v6 = vld [vmem:[%s1309_s0 + $0x480] sm:$0xff]  ;;  %v715_v7 = vld [vmem:[%s1309_s0 + $0x488] sm:$0xff] }
  0x2e   :  { %686 = vmatpush.msk.msra.mxu2 %vm59_vm0, %v680_v19  ;;  %688 = vmatpush.msk.msra.mxu3 %vm59_vm0, %v681_v20  ;;  %v716_v8 = vld [vmem:[%s1309_s0 + $0x490] sm:$0xff]  ;;  %v717_v9 = vld [vmem:[%s1309_s0 + $0x498] sm:$0xff]  ;;  %v710_v10 = vld [vmem:[%s1309_s0 + $0x460] sm:$0xff] }
  0x2f   :  { %345 = vmatpush.msra.mxu0 %v674_v21  ;;  %365 = vmatpush.msra.mxu1 %v675_v22  ;;  %v711_v11 = vld [vmem:[%s1309_s0 + $0x468] sm:$0xff]  ;;  %v712_v12 = vld [vmem:[%s1309_s0 + $0x470] sm:$0xff]  ;;  %v713_v13 = vld [vmem:[%s1309_s0 + $0x478] sm:$0xff] }
  0x30   :  { %385 = vmatpush.msra.mxu2 %v676_v23  ;;  %405 = vmatpush.msra.mxu3 %v677_v24  ;;  %v706_v14 = vld [vmem:[%s1309_s0 + $0x440] sm:$0xff]  ;;  %v707_v15 = vld [vmem:[%s1309_s0 + $0x448] sm:$0xff]  ;;  %v708_v16 = vld [vmem:[%s1309_s0 + $0x450] sm:$0xff] }
  0x31   :  { %346 = vmatpush.msra.mxu0 %v670_v25  ;;  %366 = vmatpush.msra.mxu1 %v671_v26  ;;  %v709_v17 = vld [vmem:[%s1309_s0 + $0x458] sm:$0xff]  ;;  %v702_v18 = vld [vmem:[%s1309_s0 + $0x420] sm:$0xff]  ;;  %v703_v19 = vld [vmem:[%s1309_s0 + $0x428] sm:$0xff] }
  0x32   :  { %386 = vmatpush.msra.mxu2 %v672_v27  ;;  %406 = vmatpush.msra.mxu3 %v673_v28  ;;  %v704_v20 = vld [vmem:[%s1309_s0 + $0x430] sm:$0xff]  ;;  %v705_v21 = vld [vmem:[%s1309_s0 + $0x438] sm:$0xff]  ;;  %v698_v22 = vld [vmem:[%s1309_s0 + $0x400] sm:$0xff] }
  0x33   :  { %635 = vmatmul.msk.f32.vlgmr.msrb.gmra.mxu0 %vm55_vm1, %v964_v0  ;;  %637 = vmatmul.msk.f32.vlgmr.msrb.gmra.mxu1 %vm55_vm1, %v964_v0  ;;  %v699_v23 = vld [vmem:[%s1309_s0 + $0x408] sm:$0xff]  ;;  %v700_v24 = vld [vmem:[%s1309_s0 + $0x410] sm:$0xff]  ;;  %v701_v25 = vld [vmem:[%s1309_s0 + $0x418] sm:$0xff] }
  0x34   :  { %347 = vmatpush.msra.mxu0 %v666_v29  ;;  %367 = vmatpush.msra.mxu1 %v667_v30  ;;  %v694_v26 = vld [vmem:[%s1309_s0 + $0x3e0] sm:$0xff]  ;;  %v695_v27 = vld [vmem:[%s1309_s0 + $0x3e8] sm:$0xff]  ;;  %v696_v28 = vld [vmem:[%s1309_s0 + $0x3f0] sm:$0xff] }
  0x35   :  { %387 = vmatpush.msra.mxu2 %v668_v31  ;;  %407 = vmatpush.msra.mxu3 %v669_v32  ;;  %v697_v29 = vld [vmem:[%s1309_s0 + $0x3f8] sm:$0xff]  ;;  %v690_v30 = vld [vmem:[%s1309_s0 + $0x3c0] sm:$0xff]  ;;  %v691_v31 = vld [vmem:[%s1309_s0 + $0x3c8] sm:$0xff] }
  0x36   :  { %348 = vmatpush.msra.mxu0 %v662_v33  ;;  %368 = vmatpush.msra.mxu1 %v663_v34  ;;  %v692_v32 = vld [vmem:[%s1309_s0 + $0x3d0] sm:$0xff]  ;;  %v693_v33 = vld [vmem:[%s1309_s0 + $0x3d8] sm:$0xff]  ;;  %v563_v34 = vld [vmem:[%s1311_s2] sm:$0xff] }
  0x37   :  { %388 = vmatpush.msra.mxu2 %v664_v35  ;;  %408 = vmatpush.msra.mxu3 %v665_v36  ;;  %v740_v35 = vmov 0  }
  0x38   :  { %349 = vmatpush.msra.mxu0 %v658_v37  ;;  %369 = vmatpush.msra.mxu1 %v659_v38 }
  0x39   :  { %389 = vmatpush.msra.mxu2 %v660_v39  ;;  %409 = vmatpush.msra.mxu3 %v661_v40 }
  0x3a   :  { %350 = vmatpush.msra.mxu0 %v654_v41  ;;  %370 = vmatpush.msra.mxu1 %v655_v42 }
  0x3b   :  { %390 = vmatpush.msra.mxu2 %v656_v43  ;;  %410 = vmatpush.msra.mxu3 %v657_v44 }
  0x3c   :  { %351 = vmatpush.msra.mxu0 %v650_v45  ;;  %371 = vmatpush.msra.mxu1 %v651_v46 }
  0x3d   :  { %391 = vmatpush.msra.mxu2 %v652_v47  ;;  %411 = vmatpush.msra.mxu3 %v653_v48 }
  0x3e   :  { %352 = vmatpush.msra.mxu0 %v646_v49  ;;  %372 = vmatpush.msra.mxu1 %v647_v50 }
  0x3f   :  { %392 = vmatpush.msra.mxu2 %v648_v51  ;;  %412 = vmatpush.msra.mxu3 %v649_v52 }
  0x40   :  { %353 = vmatpush.msra.mxu0 %v642_v53  ;;  %373 = vmatpush.msra.mxu1 %v643_v54 }
  0x41   :  { %393 = vmatpush.msra.mxu2 %v644_v55  ;;  %413 = vmatpush.msra.mxu3 %v645_v56 }
  0x42   :  { %730 = vmatpush.msk.msrb.mxu0 %vm59_vm0, %v726_v57  ;;  %732 = vmatpush.msk.msrb.mxu1 %vm59_vm0, %v727_v58 }
  0x43   :  { %734 = vmatpush.msk.msrb.mxu2 %vm59_vm0, %v728_v59  ;;  %736 = vmatpush.msk.msrb.mxu3 %vm59_vm0, %v729_v60 }
  0x44   :  { %478 = vmatpush.msrb.mxu0 %v722_v61  ;;  %498 = vmatpush.msrb.mxu1 %v723_v62 }
  0x45   :  { %518 = vmatpush.msrb.mxu2 %v724_v63  ;;  %538 = vmatpush.msrb.mxu3 %v725_v1 }
  0x46   :  { %479 = vmatpush.msrb.mxu0 %v718_v2  ;;  %499 = vmatpush.msrb.mxu1 %v719_v3 }
  0x47   :  { %519 = vmatpush.msrb.mxu2 %v720_v4  ;;  %539 = vmatpush.msrb.mxu3 %v721_v5 }
  0x48   :  { %480 = vmatpush.msrb.mxu0 %v714_v6  ;;  %500 = vmatpush.msrb.mxu1 %v715_v7 }
  0x49   :  { %520 = vmatpush.msrb.mxu2 %v716_v8  ;;  %540 = vmatpush.msrb.mxu3 %v717_v9 }
  0x4a   :  { %481 = vmatpush.msrb.mxu0 %v710_v10  ;;  %501 = vmatpush.msrb.mxu1 %v711_v11 }
  0x4b   :  { %521 = vmatpush.msrb.mxu2 %v712_v12  ;;  %541 = vmatpush.msrb.mxu3 %v713_v13 }
  0x4c   :  { %482 = vmatpush.msrb.mxu0 %v706_v14  ;;  %502 = vmatpush.msrb.mxu1 %v707_v15 }
  0x4d   :  { %522 = vmatpush.msrb.mxu2 %v708_v16  ;;  %542 = vmatpush.msrb.mxu3 %v709_v17 }
  0x4e   :  { %683 = vmatmul.msk.f32.vlgmr.msra.gmra.mxu0 %vm55_vm1, %v964_v0  ;;  %685 = vmatmul.msk.f32.vlgmr.msra.gmra.mxu1 %vm55_vm1, %v964_v0 }
  0x4f   :  { %687 = vmatmul.msk.f32.vlgmr.msra.gmra.mxu2 %vm55_vm1, %v964_v0  ;;  %689 = vmatmul.msk.f32.vlgmr.msra.gmra.mxu3 %vm55_vm1, %v964_v0 }
  0x50   :  { %483 = vmatpush.msrb.mxu0 %v702_v18  ;;  %503 = vmatpush.msrb.mxu1 %v703_v19 }
  0x51   :  { %523 = vmatpush.msrb.mxu2 %v704_v20  ;;  %543 = vmatpush.msrb.mxu3 %v705_v21 }
  0x52   :  { %484 = vmatpush.msrb.mxu0 %v698_v22  ;;  %504 = vmatpush.msrb.mxu1 %v699_v23 }
  0x53   :  { %524 = vmatpush.msrb.mxu2 %v700_v24  ;;  %544 = vmatpush.msrb.mxu3 %v701_v25 }
  0x54   :  { %485 = vmatpush.msrb.mxu0 %v694_v26  ;;  %505 = vmatpush.msrb.mxu1 %v695_v27 }
  0x55   :  { %525 = vmatpush.msrb.mxu2 %v696_v28  ;;  %545 = vmatpush.msrb.mxu3 %v697_v29 }
  0x56   :  { %486 = vmatpush.msrb.mxu0 %v690_v30  ;;  %506 = vmatpush.msrb.mxu1 %v691_v31 }
  0x57   :  { %526 = vmatpush.msrb.mxu2 %v692_v32  ;;  %546 = vmatpush.msrb.mxu3 %v693_v33 }
  0x58   :  { %731 = vmatmul.msk.f32.vlgmr.msrb.gmra.mxu0 %vm55_vm1, %v964_v0  ;;  %733 = vmatmul.msk.f32.vlgmr.msrb.gmra.mxu1 %vm55_vm1, %v964_v0 }
  0x59   :  { %735 = vmatmul.msk.f32.vlgmr.msrb.gmra.mxu2 %vm55_vm1, %v964_v0  ;;  %737 = vmatmul.msk.f32.vlgmr.msrb.gmra.mxu3 %vm55_vm1, %v964_v0 }
  0x5a   :  { %739 = vset.pattern.permute.xlu0 %v740_v35 }
  0x5b   :  { %566 = vperm.xlu0 %739, %v563_v34  }
  0xa5   :  { %v129_v38 = vpop.f32.mrf.mxu2  ;;  %v149_v39 = vpop.f32.mrf.mxu3 }
  0xa6   :  { %v89_v36 = vpop.f32.mrf.mxu0  ;;  %v109_v37 = vpop.f32.mrf.mxu1 }
  0xaf   :  { %v262_v42 = vpop.f32.mrf.mxu2  ;;  %v282_v43 = vpop.f32.mrf.mxu3 }
  0xb0   :  { %v222_v40 = vpop.f32.mrf.mxu0  ;;  %v242_v41 = vpop.f32.mrf.mxu1  ;;  %v553_v62 = vmax.f32 %v129_v38, %v262_v42  ;;  %v554_v63 = vmax.f32 %v149_v39, %v282_v43 }
  0xb1   :  { %v551_v50 = vmax.f32 %v89_v36, %v222_v40  ;;  %v552_v51 = vmax.f32 %v109_v37, %v242_v41 }
  0xcb   :  { %v355_v44 = vpop.f32.mrf.mxu0  ;;  %v375_v45 = vpop.f32.mrf.mxu1 }
  0xcd   :  { %v567_v53 = vpop.permute.xlu0 %566 }
  0xd2   :  { %v395_v46 = vpop.f32.mrf.mxu2  ;;  %v415_v47 = vpop.f32.mrf.mxu3 }
  0xd5   :  { %v488_v48 = vpop.f32.mrf.mxu0  ;;  %v508_v49 = vpop.f32.mrf.mxu1 }
  0xd6   :  { %v555_v0 = vmax.f32 %v355_v44, %v488_v48  ;;  %v556_v52 = vmax.f32 %v375_v45, %v508_v49 }
  0xd8   :  { %v559_v54 = vmax.f32 %v551_v50, %v555_v0  ;;  %v560_v55 = vmax.f32 %v552_v51, %v556_v52 }
  0xda   :  { %v569_v56 = vadd.f32 %v567_v53, %v559_v54  ;;  %v570_v57 = vadd.f32 %v567_v53, %v560_v55 }
  0xdc   :  { %v573_v58 = vmax.f32 %v569_v56, 0.0  ;;  %v574_v59 = vmax.f32 %v570_v57, 0.0  ;;  %v528_v60 = vpop.f32.mrf.mxu2  ;;  %v548_v61 = vpop.f32.mrf.mxu3 }
  0xdd   :  { %v557_v1 = vmax.f32 %v395_v46, %v528_v60  ;;  %v558_v2 = vmax.f32 %v415_v47, %v548_v61 }
  0xde   :  { %577 = vst [vmem:[%s1312_s3] sm:$0xff] %v573_v58 }
  0xdf   :  { %578 = vst [vmem:[%s1312_s3 + $0x8] sm:$0xff] %v574_v59  ;;  %v561_v3 = vmax.f32 %v553_v62, %v557_v1  ;;  %v562_v4 = vmax.f32 %v554_v63, %v558_v2 }
  0xe1   :  { %v571_v5 = vadd.f32 %v567_v53, %v561_v3  ;;  %v572_v6 = vadd.f32 %v567_v53, %v562_v4 }
  0xe3   :  { %v575_v7 = vmax.f32 %v571_v5, 0.0  ;;  %v576_v8 = vmax.f32 %v572_v6, 0.0 }
  0xe5   :  { %579 = vst [vmem:[%s1312_s3 + $0x10] sm:$0xff] %v575_v7 }
  0xe6   :  { %581 = vst.msk [vmem:[%s1312_s3 + $0x18] sm:$0xff] %vm580_vm2, %v576_v8 }

// kernel: net_forward.4
= control target key start
LH: loop header
LB: loop body
LE: loop exit
PB: predicated region body
PF: predicated region fallthrough
CT: control target
= control target key end

     0   :  { %vm43_vm0 = vcmask 588800   ;;  %vm334_vm1 = vcmask 408576   ;;  %s819_s0 = inlined_call_operand.vmem [shape: f32[4,200,50], index: 0, kind: input, shape index: {}]   ;;  %s820_s1 = inlined_call_operand.vmem [shape: f32[16,200], index: 1, kind: input, shape index: {}]   ;;  %s821_s2 = inlined_call_operand.vmem [shape: f32[16,1], index: 2, kind: input, shape index: {}]   ;;  %s822_s3 = inlined_call_operand.vmem [shape: f32[16,50], index: 3, kind: output, shape index: {}]  }
   0x1   :  { %v33_v0 = vld [vmem:[%s819_s0 + $0x78] sm:$0xff]  ;;  %v367_v1 = vld [vmem:[%s819_s0 + $0x188] sm:$0xff]  ;;  %v32_v2 = vld [vmem:[%s819_s0 + $0x70] sm:$0xff] }
   0x2   :  { %50 = vmatpush.msra.mxu0 %v33_v0  ;;  %152 = vmatpush.msra.mxu3 %v367_v1  ;;  %v358_v3 = vld [vmem:[%s819_s0 + $0x140] sm:$0xff]  ;;  %v31_v5 = vld [vmem:[%s819_s0 + $0x68] sm:$0xff]  ;;  %v357_v6 = vld [vmem:[%s819_s0 + $0x138] sm:$0xff] }
   0x3   :  { %v366_v4 = vld [vmem:[%s819_s0 + $0x180] sm:$0xff]  ;;  %122 = vmatpush.msra.mxu2 %v358_v3  ;;  %v365_v7 = vld [vmem:[%s819_s0 + $0x178] sm:$0xff]  ;;  %v356_v8 = vld [vmem:[%s819_s0 + $0x130] sm:$0xff] }
   0x4   :  { %51 = vmatpush.msra.mxu0 %v32_v2  ;;  %153 = vmatpush.msra.mxu3 %v366_v4  ;;  %v42_v9 = vld [vmem:[%s819_s0 + $0xc0] sm:$0xff]  ;;  %v364_v11 = vld [vmem:[%s819_s0 + $0x170] sm:$0xff]  ;;  %v355_v12 = vld [vmem:[%s819_s0 + $0x128] sm:$0xff] }
   0x5   :  { %123 = vmatpush.msra.mxu2 %v357_v6  ;;  %v30_v10 = vld [vmem:[%s819_s0 + $0x60] sm:$0xff]  ;;  %80 = vmatpush.msra.mxu1 %v42_v9  ;;  %v41_v13 = vld [vmem:[%s819_s0 + $0xb8] sm:$0xff]  ;;  %v363_v15 = vld [vmem:[%s819_s0 + $0x168] sm:$0xff] }
   0x6   :  { %52 = vmatpush.msra.mxu0 %v31_v5  ;;  %154 = vmatpush.msra.mxu3 %v365_v7  ;;  %v29_v14 = vld [vmem:[%s819_s0 + $0x58] sm:$0xff]  ;;  %v40_v16 = vld [vmem:[%s819_s0 + $0xb0] sm:$0xff]  ;;  %v354_v17 = vld [vmem:[%s819_s0 + $0x120] sm:$0xff] }
   0x7   :  { %124 = vmatpush.msra.mxu2 %v356_v8  ;;  %81 = vmatpush.msra.mxu1 %v41_v13  ;;  %v39_v18 = vld [vmem:[%s819_s0 + $0xa8] sm:$0xff]  ;;  %v28_v19 = vld [vmem:[%s819_s0 + $0x50] sm:$0xff]  ;;  %v362_v20 = vld [vmem:[%s819_s0 + $0x160] sm:$0xff] }
   0x8   :  { %53 = vmatpush.msra.mxu0 %v30_v10  ;;  %155 = vmatpush.msra.mxu3 %v364_v11  ;;  %v353_v21 = vld [vmem:[%s819_s0 + $0x118] sm:$0xff]  ;;  %v38_v22 = vld [vmem:[%s819_s0 + $0xa0] sm:$0xff]  ;;  %v27_v23 = vld [vmem:[%s819_s0 + $0x48] sm:$0xff] }
   0x9   :  { %125 = vmatpush.msra.mxu2 %v355_v12  ;;  %82 = vmatpush.msra.mxu1 %v40_v16  ;;  %v361_v24 = vld [vmem:[%s819_s0 + $0x158] sm:$0xff]  ;;  %v352_v25 = vld [vmem:[%s819_s0 + $0x110] sm:$0xff]  ;;  %v26_v27 = vld [vmem:[%s819_s0 + $0x40] sm:$0xff] }
   0xa   :  { %54 = vmatpush.msra.mxu0 %v29_v14  ;;  %156 = vmatpush.msra.mxu3 %v363_v15  ;;  %v37_v26 = vld [vmem:[%s819_s0 + $0x98] sm:$0xff]  ;;  %v360_v28 = vld [vmem:[%s819_s0 + $0x150] sm:$0xff]  ;;  %v351_v29 = vld [vmem:[%s819_s0 + $0x108] sm:$0xff] }
   0xb   :  { %126 = vmatpush.msra.mxu2 %v354_v17  ;;  %83 = vmatpush.msra.mxu1 %v39_v18  ;;  %v36_v30 = vld [vmem:[%s819_s0 + $0x90] sm:$0xff]  ;;  %v25_v31 = vld [vmem:[%s819_s0 + $0x38] sm:$0xff]  ;;  %v359_v32 = vld [vmem:[%s819_s0 + $0x148] sm:$0xff] }
   0xc   :  { %55 = vmatpush.msra.mxu0 %v28_v19  ;;  %157 = vmatpush.msra.mxu3 %v362_v20  ;;  %v394_v33 = vld [vmem:[%s819_s0 + $0x250] sm:$0xff]  ;;  %v350_v34 = vld [vmem:[%s819_s0 + $0x100] sm:$0xff]  ;;  %v35_v36 = vld [vmem:[%s819_s0 + $0x88] sm:$0xff] }
   0xd   :  { %127 = vmatpush.msra.mxu2 %v353_v21  ;;  %84 = vmatpush.msra.mxu1 %v38_v22  ;;  %v24_v35 = vld [vmem:[%s819_s0 + $0x30] sm:$0xff]  ;;  %v393_v37 = vld [vmem:[%s819_s0 + $0x248] sm:$0xff]  ;;  %v349_v38 = vld [vmem:[%s819_s0 + $0xf8] sm:$0xff] }
   0xe   :  { %56 = vmatpush.msra.mxu0 %v27_v23  ;;  %158 = vmatpush.msra.mxu3 %v361_v24  ;;  %v23_v39 = vld [vmem:[%s819_s0 + $0x28] sm:$0xff]  ;;  %v34_v40 = vld [vmem:[%s819_s0 + $0x80] sm:$0xff]  ;;  %v348_v42 = vld [vmem:[%s819_s0 + $0xf0] sm:$0xff] }
   0xf   :  { %128 = vmatpush.msra.mxu2 %v352_v25  ;;  %85 = vmatpush.msra.mxu1 %v37_v26  ;;  %v392_v41 = vld [vmem:[%s819_s0 + $0x240] sm:$0xff]  ;;  %v385_v44 = vld [vmem:[%s819_s0 + $0x208] sm:$0xff]  ;;  %v391_v45 = vld [vmem:[%s819_s0 + $0x238] sm:$0xff] }
  0x10   :  { %57 = vmatpush.msra.mxu0 %v26_v27  ;;  %159 = vmatpush.msra.mxu3 %v360_v28  ;;  %v22_v43 = vld [vmem:[%s819_s0 + $0x20] sm:$0xff]  ;;  %v347_v46 = vld [vmem:[%s819_s0 + $0xe8] sm:$0xff]  ;;  %v21_v47 = vld [vmem:[%s819_s0 + $0x18] sm:$0xff] }
  0x11   :  { %129 = vmatpush.msra.mxu2 %v351_v29  ;;  %86 = vmatpush.msra.mxu1 %v36_v30  ;;  %v384_v48 = vld [vmem:[%s819_s0 + $0x200] sm:$0xff]  ;;  %v390_v49 = vld [vmem:[%s819_s0 + $0x230] sm:$0xff]  ;;  %v383_v52 = vld [vmem:[%s819_s0 + $0x1f8] sm:$0xff] }
  0x12   :  { %58 = vmatpush.msra.mxu0 %v25_v31  ;;  %160 = vmatpush.msra.mxu3 %v359_v32  ;;  %v346_v50 = vld [vmem:[%s819_s0 + $0xe0] sm:$0xff]  ;;  %v20_v51 = vld [vmem:[%s819_s0 + $0x10] sm:$0xff]  ;;  %v389_v53 = vld [vmem:[%s819_s0 + $0x228] sm:$0xff] }
  0x13   :  { %130 = vmatpush.msra.mxu2 %v350_v34  ;;  %87 = vmatpush.msra.mxu1 %v35_v36  ;;  %v345_v54 = vld [vmem:[%s819_s0 + $0xd8] sm:$0xff]  ;;  %v19_v55 = vld [vmem:[%s819_s0 + $0x8] sm:$0xff]  ;;  %v382_v56 = vld [vmem:[%s819_s0 + $0x1f0] sm:$0xff] }
  0x14   :  { %224 = vmatpush.msrb.mxu3 %v394_v33  ;;  %59 = vmatpush.msra.mxu0 %v24_v35  ;;  %v388_v57 = vld [vmem:[%s819_s0 + $0x220] sm:$0xff]  ;;  %v344_v58 = vld [vmem:[%s819_s0 + $0xd0] sm:$0xff]  ;;  %v381_v60 = vld [vmem:[%s819_s0 + $0x1e8] sm:$0xff] }
  0x15   :  { %131 = vmatpush.msra.mxu2 %v349_v38  ;;  %88 = vmatpush.msra.mxu1 %v34_v40  ;;  %v18_v59 = vld [vmem:[%s819_s0] sm:$0xff]  ;;  %v387_v61 = vld [vmem:[%s819_s0 + $0x218] sm:$0xff]  ;;  %v412_v62 = vld [vmem:[%s819_s0 + $0x2d0] sm:$0xff] }
  0x16   :  { %225 = vmatpush.msrb.mxu3 %v393_v37  ;;  %60 = vmatpush.msra.mxu0 %v23_v39  ;;  %v343_v63 = vld [vmem:[%s819_s0 + $0xc8] sm:$0xff]  ;;  %v663_v1 = vld [vmem:[%s820_s1] sm:$0xff]  ;;  %v386_v2 = vld [vmem:[%s819_s0 + $0x210] sm:$0xff] }
  0x17   :  { %132 = vmatpush.msra.mxu2 %v348_v42  ;;  %194 = vmatpush.msrb.mxu1 %v385_v44  ;;  %v658_v0 = vld [vmem:[%s820_s1 + $0x8] sm:$0xff]  ;;  %v380_v4 = vld [vmem:[%s819_s0 + $0x1e0] sm:$0xff]  ;;  %v379_v6 = vld [vmem:[%s819_s0 + $0x1d8] sm:$0xff] }
  0x18   :  { %226 = vmatpush.msrb.mxu3 %v392_v41  ;;  %61 = vmatpush.msra.mxu0 %v22_v43  ;;  %v411_v3 = vld [vmem:[%s819_s0 + $0x2c8] sm:$0xff]  ;;  %v410_v5 = vld [vmem:[%s819_s0 + $0x2c0] sm:$0xff]  ;;  %v409_v7 = vld [vmem:[%s819_s0 + $0x2b8] sm:$0xff]  ;;  %v442_v41 = vmov 0  }
  0x19   :  { %133 = vmatpush.msra.mxu2 %v347_v46  ;;  %195 = vmatpush.msrb.mxu1 %v384_v48  ;;  %v378_v8 = vld [vmem:[%s819_s0 + $0x1d0] sm:$0xff]  ;;  %v421_v9 = vld [vmem:[%s819_s0 + $0x318] sm:$0xff]  ;;  %v377_v11 = vld [vmem:[%s819_s0 + $0x1c8] sm:$0xff] }
  0x1a   :  { %227 = vmatpush.msrb.mxu3 %v391_v45  ;;  %62 = vmatpush.msra.mxu0 %v21_v47  ;;  %v408_v10 = vld [vmem:[%s819_s0 + $0x2b0] sm:$0xff]  ;;  %v709_v13 = vld [vmem:[%s820_s1 + $0x18] sm:$0xff]  ;;  %v407_v14 = vld [vmem:[%s819_s0 + $0x2a8] sm:$0xff] }
  0x1b   :  { %134 = vmatpush.msra.mxu2 %v346_v50  ;;  %196 = vmatpush.msrb.mxu1 %v383_v52  ;;  %v704_v12 = vld [vmem:[%s820_s1 + $0x10] sm:$0xff]  ;;  %v376_v16 = vld [vmem:[%s819_s0 + $0x1c0] sm:$0xff]  ;;  %v419_v18 = vld [vmem:[%s819_s0 + $0x308] sm:$0xff] }
  0x1c   :  { %228 = vmatpush.msrb.mxu3 %v390_v49  ;;  %63 = vmatpush.msra.mxu0 %v20_v51  ;;  %v420_v15 = vld [vmem:[%s819_s0 + $0x310] sm:$0xff]  ;;  %v406_v17 = vld [vmem:[%s819_s0 + $0x2a0] sm:$0xff]  ;;  %v375_v19 = vld [vmem:[%s819_s0 + $0x1b8] sm:$0xff] }
  0x1d   :  { %135 = vmatpush.msra.mxu2 %v345_v54  ;;  %197 = vmatpush.msrb.mxu1 %v382_v56  ;;  %v405_v20 = vld [vmem:[%s819_s0 + $0x298] sm:$0xff]  ;;  %v418_v21 = vld [vmem:[%s819_s0 + $0x300] sm:$0xff]  ;;  %v374_v22 = vld [vmem:[%s819_s0 + $0x1b0] sm:$0xff] }
  0x1e   :  { %229 = vmatpush.msrb.mxu3 %v389_v53  ;;  %64 = vmatpush.msra.mxu0 %v19_v55  ;;  %v404_v23 = vld [vmem:[%s819_s0 + $0x290] sm:$0xff]  ;;  %v417_v24 = vld [vmem:[%s819_s0 + $0x2f8] sm:$0xff]  ;;  %v373_v25 = vld [vmem:[%s819_s0 + $0x1a8] sm:$0xff] }
  0x1f   :  { %136 = vmatpush.msra.mxu2 %v344_v58  ;;  %198 = vmatpush.msrb.mxu1 %v381_v60  ;;  %v403_v26 = vld [vmem:[%s819_s0 + $0x288] sm:$0xff]  ;;  %v416_v27 = vld [vmem:[%s819_s0 + $0x2f0] sm:$0xff]  ;;  %v372_v28 = vld [vmem:[%s819_s0 + $0x1a0] sm:$0xff] }
  0x20   :  { %230 = vmatpush.msrb.mxu3 %v388_v57  ;;  %65 = vmatpush.msra.mxu0 %v18_v59  ;;  %v402_v29 = vld [vmem:[%s819_s0 + $0x280] sm:$0xff]  ;;  %v415_v30 = vld [vmem:[%s819_s0 + $0x2e8] sm:$0xff]  ;;  %v371_v31 = vld [vmem:[%s819_s0 + $0x198] sm:$0xff] }
  0x21   :  { %137 = vmatpush.msra.mxu2 %v343_v63  ;;  %368 = vmatmul.msk.f32.vlgmr.msra.gmra.mxu3 %vm43_vm0, %v658_v0  ;;  %v401_v32 = vld [vmem:[%s819_s0 + $0x278] sm:$0xff]  ;;  %v414_v33 = vld [vmem:[%s819_s0 + $0x2e0] sm:$0xff]  ;;  %v370_v34 = vld [vmem:[%s819_s0 + $0x190] sm:$0xff] }
  0x22   :  { %231 = vmatpush.msrb.mxu3 %v387_v61  ;;  %266 = vmatpush.msrb.mxu0 %v412_v62  ;;  %v400_v35 = vld [vmem:[%s819_s0 + $0x270] sm:$0xff]  ;;  %v413_v36 = vld [vmem:[%s819_s0 + $0x2d8] sm:$0xff]  ;;  %v399_v37 = vld [vmem:[%s819_s0 + $0x268] sm:$0xff] }
  0x23   :  { %138 = vmatmul.f32.vlgmr.msra.gmra.mxu2 %v663_v1  ;;  %199 = vmatpush.msrb.mxu1 %v380_v4  ;;  %v398_v38 = vld [vmem:[%s819_s0 + $0x260] sm:$0xff]  ;;  %v397_v40 = vld [vmem:[%s819_s0 + $0x258] sm:$0xff]  ;;  %v319_v42 = vld [vmem:[%s821_s2 + $0x8] sm:$0xff] }
  0x24   :  { %232 = vmatpush.msrb.mxu3 %v386_v2  ;;  %267 = vmatpush.msrb.mxu0 %v411_v3  ;;  %v318_v39 = vld [vmem:[%s821_s2] sm:$0xff] }
  0x25   :  { %66 = vmatmul.f32.vlgmr.msra.gmra.mxu0 %v663_v1  ;;  %200 = vmatpush.msrb.mxu1 %v379_v6 }
  0x26   :  { %424 = vmatpush.msra.mxu3 %v412_v62  ;;  %268 = vmatpush.msrb.mxu0 %v410_v5 }
  0x27   :  { %341 = vmatmul.msk.f32.vlgmr.msra.gmra.mxu1 %vm43_vm0, %v658_v0  ;;  %296 = vmatpush.msrb.mxu2 %v421_v9 }
  0x28   :  { %425 = vmatpush.msra.mxu3 %v411_v3  ;;  %269 = vmatpush.msrb.mxu0 %v409_v7 }
  0x29   :  { %201 = vmatpush.msrb.mxu1 %v378_v8  ;;  %369 = vmatmul.msk.f32.gmra.mxu3 %vm43_vm0, %v709_v13 }
  0x2a   :  { %426 = vmatpush.msra.mxu3 %v410_v5  ;;  %270 = vmatpush.msrb.mxu0 %v408_v10 }
  0x2b   :  { %202 = vmatpush.msrb.mxu1 %v377_v11  ;;  %141 = vmatmul.f32.gmra.mxu2 %v704_v12 }
  0x2c   :  { %427 = vmatpush.msra.mxu3 %v409_v7  ;;  %271 = vmatpush.msrb.mxu0 %v407_v14 }
  0x2d   :  { %297 = vmatpush.msrb.mxu2 %v420_v15  ;;  %203 = vmatpush.msrb.mxu1 %v376_v16 }
  0x2e   :  { %428 = vmatpush.msra.mxu3 %v408_v10  ;;  %272 = vmatpush.msrb.mxu0 %v406_v17 }
  0x2f   :  { %298 = vmatpush.msrb.mxu2 %v419_v18  ;;  %204 = vmatpush.msrb.mxu1 %v375_v19 }
  0x30   :  { %429 = vmatpush.msra.mxu3 %v407_v14  ;;  %273 = vmatpush.msrb.mxu0 %v405_v20 }
  0x31   :  { %299 = vmatpush.msrb.mxu2 %v418_v21  ;;  %205 = vmatpush.msrb.mxu1 %v374_v22 }
  0x32   :  { %430 = vmatpush.msra.mxu3 %v406_v17  ;;  %69 = vmatmul.f32.gmra.mxu0 %v704_v12 }
  0x33   :  { %342 = vmatmul.msk.f32.gmra.mxu1 %vm43_vm0, %v709_v13  ;;  %274 = vmatpush.msrb.mxu0 %v404_v23 }
  0x34   :  { %300 = vmatpush.msrb.mxu2 %v417_v24  ;;  %206 = vmatpush.msrb.mxu1 %v373_v25 }
  0x35   :  { %431 = vmatpush.msra.mxu3 %v405_v20  ;;  %275 = vmatpush.msrb.mxu0 %v403_v26 }
  0x36   :  { %395 = vmatmul.msk.f32.vlgmr.msrb.gmra.mxu3 %vm43_vm0, %v658_v0  ;;  %301 = vmatpush.msrb.mxu2 %v416_v27 }
  0x37   :  { %207 = vmatpush.msrb.mxu1 %v372_v28  ;;  %432 = vmatpush.msra.mxu3 %v404_v23 }
  0x38   :  { %276 = vmatpush.msrb.mxu0 %v402_v29  ;;  %302 = vmatpush.msrb.mxu2 %v415_v30 }
  0x39   :  { %208 = vmatpush.msrb.mxu1 %v371_v31  ;;  %433 = vmatpush.msra.mxu3 %v403_v26 }
  0x3a   :  { %277 = vmatpush.msrb.mxu0 %v401_v32  ;;  %303 = vmatpush.msrb.mxu2 %v414_v33 }
  0x3b   :  { %209 = vmatpush.msrb.mxu1 %v370_v34  ;;  %434 = vmatpush.msra.mxu3 %v402_v29 }
  0x3c   :  { %210 = vmatmul.f32.vlgmr.msrb.gmra.mxu1 %v663_v1  ;;  %278 = vmatpush.msrb.mxu0 %v400_v35 }
  0x3d   :  { %304 = vmatpush.msrb.mxu2 %v413_v36  ;;  %435 = vmatpush.msra.mxu3 %v401_v32 }
  0x3e   :  { %422 = vmatmul.msk.f32.vlgmr.msrb.gmra.mxu2 %vm43_vm0, %v658_v0  ;;  %396 = vmatmul.msk.f32.gmra.mxu3 %vm43_vm0, %v709_v13 }
  0x3f   :  { %279 = vmatpush.msrb.mxu0 %v399_v37  ;;  %436 = vmatpush.msra.mxu3 %v400_v35 }
  0x40   :  { %441 = vset.pattern.permute.xlu0 %v442_v41 }
  0x41   :  { %280 = vmatpush.msrb.mxu0 %v398_v38  ;;  %437 = vmatpush.msra.mxu3 %v399_v37 }
  0x42   :  { %322 = vperm.xlu0 %441, %v318_v39  }
  0x43   :  { %281 = vmatpush.msrb.mxu0 %v397_v40  ;;  %438 = vmatpush.msra.mxu3 %v398_v38 }
  0x44   :  { %282 = vmatmul.f32.vlgmr.msrb.gmra.mxu0 %v663_v1  ;;  %213 = vmatmul.f32.gmra.mxu1 %v704_v12 }
  0x45   :  { %439 = vmatpush.msra.mxu3 %v397_v40 }
  0x46   :  { %285 = vmatmul.f32.vlgmr.msra.gmra.mxu3 %v704_v12  ;;  %423 = vmatmul.msk.f32.gmra.mxu2 %vm43_vm0, %v709_v13 }
  0x4a   :  { %327 = vperm.xlu0 %441, %v319_v42  }
  0xa2   :  { %v67_v46 = vpop.f32.mrf.mxu0 }
  0xa4   :  { %v162_v43 = vpop.f32.mrf.mxu3  ;;  %v90_v44 = vpop.f32.mrf.mxu1 }
  0xa5   :  { %v91_v53 = vadd.f32 %v90_v44, %v67_v46 }
  0xa6   :  { %v139_v45 = vpop.f32.mrf.mxu2 }
  0xa7   :  { %v163_v54 = vadd.f32 %v162_v43, %v139_v45 }
  0xa9   :  { %v312_v60 = vmax.f32 %v91_v53, %v163_v54 }
  0xac   :  { %v165_v47 = vpop.f32.mrf.mxu3 }
  0xae   :  { %v142_v49 = vpop.f32.mrf.mxu2 }
  0xaf   :  { %v70_v50 = vpop.f32.mrf.mxu0  ;;  %v166_v3 = vadd.f32 %v165_v47, %v142_v49 }
  0xb0   :  { %v93_v48 = vpop.f32.mrf.mxu1 }
  0xb1   :  { %v94_v2 = vadd.f32 %v93_v48, %v70_v50 }
  0xb3   :  { %v313_v9 = vmax.f32 %v94_v2, %v166_v3 }
  0xb4   :  { %v323_v62 = vpop.permute.xlu0 %322 }
  0xb9   :  { %v234_v51 = vpop.f32.mrf.mxu3  ;;  %v211_v52 = vpop.f32.mrf.mxu1 }
  0xba   :  { %v235_v57 = vadd.f32 %v234_v51, %v211_v52 }
  0xbc   :  { %v328_v12 = vpop.permute.xlu0 %327 }
  0xc1   :  { %v283_v55 = vpop.f32.mrf.mxu0  ;;  %v306_v56 = vpop.f32.mrf.mxu2 }
  0xc2   :  { %v307_v58 = vadd.f32 %v306_v56, %v283_v55  ;;  %v237_v59 = vpop.f32.mrf.mxu3  ;;  %v214_v1 = vpop.f32.mrf.mxu1 }
  0xc3   :  { %v238_v7 = vadd.f32 %v237_v59, %v214_v1 }
  0xc4   :  { %v314_v61 = vmax.f32 %v235_v57, %v307_v58 }
  0xc6   :  { %v316_v63 = vmax.f32 %v312_v60, %v314_v61 }
  0xc8   :  { %v330_v0 = vadd.f32 %v323_v62, %v316_v63 }
  0xc9   :  { %v309_v4 = vpop.f32.mrf.mxu2 }
  0xca   :  { %v332_v5 = vmax.f32 %v330_v0, 0.0  ;;  %v286_v6 = vpop.f32.mrf.mxu3 }
  0xcb   :  { %v310_v8 = vadd.f32 %v309_v4, %v286_v6 }
  0xcc   :  { %335 = vst.msk [vmem:[%s822_s3] sm:$0xff] %vm334_vm1, %v332_v5 }
  0xcd   :  { %v315_v10 = vmax.f32 %v238_v7, %v310_v8 }
  0xcf   :  { %v317_v11 = vmax.f32 %v313_v9, %v315_v10 }
  0xd1   :  { %v331_v13 = vadd.f32 %v328_v12, %v317_v11 }
  0xd3   :  { %v333_v14 = vmax.f32 %v331_v13, 0.0 }
  0xd5   :  { %336 = vst.msk [vmem:[%s822_s3 + $0x8] sm:$0xff] %vm334_vm1, %v333_v14 }

// kernel: net_forward.5
= control target key start
LH: loop header
LB: loop body
LE: loop exit
PB: predicated region body
PF: predicated region fallthrough
CT: control target
= control target key end

     0   :  { %s584_s0 = inlined_call_operand.vmem [shape: f32[2,400], index: 0, kind: input, shape index: {}]   ;;  %s585_s1 = inlined_call_operand.vmem [shape: f32[400,128], index: 1, kind: input, shape index: {}]   ;;  %s586_s2 = inlined_call_operand.vmem [shape: f32[128,128], index: 2, kind: input, shape index: {}]   ;;  %s587_s3 = inlined_call_operand.vmem [shape: f32[128,128], index: 3, kind: input, shape index: {}]   ;;  %s588_s4 = inlined_call_operand.vmem [shape: f32[3,128], index: 4, kind: input, shape index: {}]   ;;  %s589_s5 = inlined_call_operand.hbm [shape: f32[2,128], index: 5, kind: output, shape index: {}]  }
   0x1   :  { %v69_v0 = vld [vmem:[%s585_s1 + $0x178] sm:$0xff]  ;;  %v68_v2 = vld [vmem:[%s585_s1 + $0x170] sm:$0xff]  ;;  %v67_v5 = vld [vmem:[%s585_s1 + $0x168] sm:$0xff] }
   0x2   :  { %v37_v1 = vld [vmem:[%s585_s1 + $0x78] sm:$0xff]  ;;  %126 = vmatpush.msra.mxu2 %v69_v0  ;;  %v36_v3 = vld [vmem:[%s585_s1 + $0x70] sm:$0xff]  ;;  %v35_v6 = vld [vmem:[%s585_s1 + $0x68] sm:$0xff] }
   0x3   :  { %86 = vmatpush.msra.mxu0 %v37_v1  ;;  %v53_v4 = vld [vmem:[%s585_s1 + $0xf8] sm:$0xff]  ;;  %v52_v7 = vld [vmem:[%s585_s1 + $0xf0] sm:$0xff]  ;;  %v51_v8 = vld [vmem:[%s585_s1 + $0xe8] sm:$0xff] }
   0x4   :  { %106 = vmatpush.msra.mxu1 %v53_v4  ;;  %127 = vmatpush.msra.mxu2 %v68_v2  ;;  %v66_v9 = vld [vmem:[%s585_s1 + $0x160] sm:$0xff]  ;;  %v65_v12 = vld [vmem:[%s585_s1 + $0x158] sm:$0xff]  ;;  %v64_v15 = vld [vmem:[%s585_s1 + $0x150] sm:$0xff] }
   0x5   :  { %87 = vmatpush.msra.mxu0 %v36_v3  ;;  %v34_v10 = vld [vmem:[%s585_s1 + $0x60] sm:$0xff]  ;;  %v33_v13 = vld [vmem:[%s585_s1 + $0x58] sm:$0xff]  ;;  %v32_v16 = vld [vmem:[%s585_s1 + $0x50] sm:$0xff] }
   0x6   :  { %107 = vmatpush.msra.mxu1 %v52_v7  ;;  %128 = vmatpush.msra.mxu2 %v67_v5  ;;  %v50_v11 = vld [vmem:[%s585_s1 + $0xe0] sm:$0xff]  ;;  %v49_v14 = vld [vmem:[%s585_s1 + $0xd8] sm:$0xff]  ;;  %v48_v17 = vld [vmem:[%s585_s1 + $0xd0] sm:$0xff] }
   0x7   :  { %88 = vmatpush.msra.mxu0 %v35_v6  ;;  %v63_v18 = vld [vmem:[%s585_s1 + $0x148] sm:$0xff]  ;;  %v62_v21 = vld [vmem:[%s585_s1 + $0x140] sm:$0xff]  ;;  %v61_v24 = vld [vmem:[%s585_s1 + $0x138] sm:$0xff] }
   0x8   :  { %108 = vmatpush.msra.mxu1 %v51_v8  ;;  %129 = vmatpush.msra.mxu2 %v66_v9  ;;  %v31_v19 = vld [vmem:[%s585_s1 + $0x48] sm:$0xff]  ;;  %v30_v22 = vld [vmem:[%s585_s1 + $0x40] sm:$0xff]  ;;  %v29_v25 = vld [vmem:[%s585_s1 + $0x38] sm:$0xff] }
   0x9   :  { %89 = vmatpush.msra.mxu0 %v34_v10  ;;  %v47_v20 = vld [vmem:[%s585_s1 + $0xc8] sm:$0xff]  ;;  %v46_v23 = vld [vmem:[%s585_s1 + $0xc0] sm:$0xff]  ;;  %v45_v26 = vld [vmem:[%s585_s1 + $0xb8] sm:$0xff] }
   0xa   :  { %109 = vmatpush.msra.mxu1 %v50_v11  ;;  %130 = vmatpush.msra.mxu2 %v65_v12  ;;  %v71_v27 = vld [vmem:[%s585_s1 + $0x188] sm:$0xff]  ;;  %v21_v28 = vld [vmem:[%s584_s0] sm:$0xff]  ;;  %v60_v29 = vld [vmem:[%s585_s1 + $0x130] sm:$0xff] }
   0xb   :  { %90 = vmatpush.msra.mxu0 %v33_v13  ;;  %v28_v30 = vld [vmem:[%s585_s1 + $0x30] sm:$0xff]  ;;  %160 = vmatpush.msra.mxu3 %v71_v27  ;;  %75 = vst [vmem:[#allocation1] ss:$4 sm:$0xff] %v21_v28  ;;  %v70_v31 = vld [vmem:[%s585_s1 + $0x180] sm:$0xff]  ;;  %v182_v33 = vld [vmem:[%s586_s2 + $0x78] sm:$0xff] }
   0xc   :  { %110 = vmatpush.msra.mxu1 %v49_v14  ;;  %131 = vmatpush.msra.mxu2 %v64_v15  ;;  %v44_v32 = vld [vmem:[%s585_s1 + $0xb0] sm:$0xff]  ;;  %v59_v34 = vld [vmem:[%s585_s1 + $0x128] sm:$0xff]  ;;  %v58_v36 = vld [vmem:[%s585_s1 + $0x120] sm:$0xff] }
   0xd   :  { %91 = vmatpush.msra.mxu0 %v32_v16  ;;  %v27_v35 = vld [vmem:[%s585_s1 + $0x28] sm:$0xff]  ;;  %161 = vmatpush.msra.mxu3 %v70_v31  ;;  %v26_v37 = vld [vmem:[%s585_s1 + $0x20] sm:$0xff]  ;;  %v181_v39 = vld [vmem:[%s586_s2 + $0x70] sm:$0xff] }
   0xe   :  { %111 = vmatpush.msra.mxu1 %v48_v17  ;;  %132 = vmatpush.msra.mxu2 %v63_v18  ;;  %v43_v38 = vld [vmem:[%s585_s1 + $0xa8] sm:$0xff]  ;;  %v42_v40 = vld [vmem:[%s585_s1 + $0xa0] sm:$0xff] }
   0xf   :  { %92 = vmatpush.msra.mxu0 %v31_v19  ;;  %185 = vmatpush.msrb.mxu3 %v182_v33  ;;  %v180_v41 = vld [vmem:[%s586_s2 + $0x68] sm:$0xff] }
  0x10   :  { %112 = vmatpush.msra.mxu1 %v47_v20  ;;  %133 = vmatpush.msra.mxu2 %v62_v21 }
  0x11   :  { %93 = vmatpush.msra.mxu0 %v30_v22 }
  0x12   :  { %113 = vmatpush.msra.mxu1 %v46_v23  ;;  %134 = vmatpush.msra.mxu2 %v61_v24 }
  0x13   :  { %94 = vmatpush.msra.mxu0 %v29_v25 }
  0x14   :  { %114 = vmatpush.msra.mxu1 %v45_v26  ;;  %135 = vmatpush.msra.mxu2 %v60_v29 }
  0x15   :  { %95 = vmatpush.msra.mxu0 %v28_v30 }
  0x16   :  { %115 = vmatpush.msra.mxu1 %v44_v32  ;;  %136 = vmatpush.msra.mxu2 %v59_v34 }
  0x17   :  { %96 = vmatpush.msra.mxu0 %v27_v35 }
  0x18   :  { %10 = vsyncpa [#allocation3], 0  ;;  %116 = vmatpush.msra.mxu1 %v43_v38  ;;  %v57_v42 = vld [vmem:[%s585_s1 + $0x118] sm:$0xff]  ;;  %186 = vmatpush.msrb.mxu3 %v181_v39  ;;  %vm83_vm0 = vcmask 130048   ;;  %v56_v45 = vld [vmem:[%s585_s1 + $0x110] sm:$0xff]  ;;  %s292_s7 = smov [#allocation2]  }
  0x19   :  { %v25_v43 = vld [vmem:[%s585_s1 + $0x18] sm:$0xff]  ;;  %137 = vmatpush.msra.mxu2 %v58_v36  ;;  %97 = vmatpush.msra.mxu0 %v26_v37  ;;  %v24_v46 = vld [vmem:[%s585_s1 + $0x10] sm:$0xff]  ;;  %v179_v49 = vld [vmem:[%s586_s2 + $0x60] sm:$0xff]  ;;  %s250_s8 = sshll.u32 %s292_s7, 4  ;;  %s252_s9 = sshll.u32 %s589_s5, 4  ;;  %s251_s8 = int_to_ptr.vmem [resolvable:$true] %s250_s8  ;;  %s253_s9 = int_to_ptr.hbm [resolvable:$true] %s252_s9 }
  0x1a   :  { %v41_v44 = vld [vmem:[%s585_s1 + $0x98] sm:$0xff]  ;;  %117 = vmatpush.msra.mxu1 %v42_v40  ;;  %187 = vmatpush.msrb.mxu3 %v180_v41  ;;  %v40_v48 = vld [vmem:[%s585_s1 + $0x90] sm:$0xff]  ;;  %v55_v50 = vld [vmem:[%s585_s1 + $0x108] sm:$0xff] }
  0x1b   :  { %v79_v47 = vld.sshfl [vmem:[#allocation1 + $0x18] sm:$0xff pattern:$0x73625140]  ;;  %138 = vmatpush.msra.mxu2 %v57_v42  ;;  %98 = vmatpush.msra.mxu0 %v25_v43  ;;  %v23_v51 = vld [vmem:[%s585_s1 + $0x8] sm:$0xff]  ;;  %v54_v54 = vld [vmem:[%s585_s1 + $0x100] sm:$0xff] }
  0x1c   :  { %118 = vmatpush.msra.mxu1 %v41_v44  ;;  %261 = vmatmul.msk.f32.vlgmr.msra.gmra.mxu3 %vm83_vm0, %v79_v47  ;;  %v39_v52 = vld [vmem:[%s585_s1 + $0x88] sm:$0xff]  ;;  %v178_v53 = vld [vmem:[%s586_s2 + $0x58] sm:$0xff]  ;;  %v22_v55 = vld [vmem:[%s585_s1] sm:$0xff] }
  0x1d   :  { %139 = vmatpush.msra.mxu2 %v56_v45  ;;  %99 = vmatpush.msra.mxu0 %v24_v46  ;;  %v78_v56 = vld.sshfl [vmem:[#allocation1 + $0x10] sm:$0xff pattern:$0x73625140]  ;;  %v76_v57 = vld.sshfl [vmem:[#allocation1] sm:$0xff pattern:$0x73625140] }
  0x1e   :  { %119 = vmatpush.msra.mxu1 %v40_v48  ;;  %188 = vmatpush.msrb.mxu3 %v179_v49  ;;  %v38_v58 = vld [vmem:[%s585_s1 + $0x80] sm:$0xff]  ;;  %v177_v59 = vld [vmem:[%s586_s2 + $0x50] sm:$0xff]  ;;  %v77_v60 = vld.sshfl [vmem:[#allocation1 + $0x8] sm:$0xff pattern:$0x73625140] }
  0x1f   :  { %140 = vmatpush.msra.mxu2 %v55_v50  ;;  %100 = vmatpush.msra.mxu0 %v23_v51  ;;  %v176_v61 = vld [vmem:[%s586_s2 + $0x48] sm:$0xff]  ;;  %v175_v62 = vld [vmem:[%s586_s2 + $0x40] sm:$0xff]  ;;  %v174_v63 = vld [vmem:[%s586_s2 + $0x38] sm:$0xff] }
  0x20   :  { %120 = vmatpush.msra.mxu1 %v39_v52  ;;  %189 = vmatpush.msrb.mxu3 %v178_v53  ;;  %v173_v0 = vld [vmem:[%s586_s2 + $0x30] sm:$0xff]  ;;  %v172_v1 = vld [vmem:[%s586_s2 + $0x28] sm:$0xff]  ;;  %v171_v2 = vld [vmem:[%s586_s2 + $0x20] sm:$0xff] }
  0x21   :  { %141 = vmatpush.msra.mxu2 %v54_v54  ;;  %101 = vmatpush.msra.mxu0 %v22_v55  ;;  %v170_v3 = vld [vmem:[%s586_s2 + $0x18] sm:$0xff]  ;;  %v169_v4 = vld [vmem:[%s586_s2 + $0x10] sm:$0xff]  ;;  %v168_v5 = vld [vmem:[%s586_s2 + $0x8] sm:$0xff] }
  0x22   :  { %142 = vmatmul.f32.vlgmr.msra.gmra.mxu2 %v78_v56  ;;  %102 = vmatmul.f32.vlgmr.msra.gmra.mxu0 %v76_v57  ;;  %v167_v6 = vld [vmem:[%s586_s2] sm:$0xff]  ;;  %v221_v7 = vld [vmem:[%s587_s3 + $0x78] sm:$0xff]  ;;  %v220_v8 = vld [vmem:[%s587_s3 + $0x70] sm:$0xff] }
  0x23   :  { %121 = vmatpush.msra.mxu1 %v38_v58  ;;  %190 = vmatpush.msrb.mxu3 %v177_v59  ;;  %v219_v9 = vld [vmem:[%s587_s3 + $0x68] sm:$0xff]  ;;  %v218_v10 = vld [vmem:[%s587_s3 + $0x60] sm:$0xff]  ;;  %v217_v11 = vld [vmem:[%s587_s3 + $0x58] sm:$0xff] }
  0x24   :  { %122 = vmatmul.f32.vlgmr.msra.gmra.mxu1 %v77_v60  ;;  %224 = vmatpush.msrb.mxu0 %v221_v7  ;;  %v216_v12 = vld [vmem:[%s587_s3 + $0x50] sm:$0xff]  ;;  %v215_v13 = vld [vmem:[%s587_s3 + $0x48] sm:$0xff]  ;;  %v214_v14 = vld [vmem:[%s587_s3 + $0x40] sm:$0xff] }
  0x25   :  { %191 = vmatpush.msrb.mxu3 %v176_v61  ;;  %v213_v15 = vld [vmem:[%s587_s3 + $0x38] sm:$0xff]  ;;  %v263_v16 = vld [vmem:[%s588_s4] ss:$0 sm:$0xff]  ;;  %v212_v17 = vld [vmem:[%s587_s3 + $0x30] sm:$0xff] }
  0x26   :  { %225 = vmatpush.msrb.mxu0 %v220_v8  ;;  %v211_v18 = vld [vmem:[%s587_s3 + $0x28] sm:$0xff]  ;;  %v210_v21 = vld [vmem:[%s587_s3 + $0x20] sm:$0xff]  ;;  %v209_v24 = vld [vmem:[%s587_s3 + $0x18] sm:$0xff] }
  0x27   :  { %192 = vmatpush.msrb.mxu3 %v175_v62  ;;  %v208_v30 = vld [vmem:[%s587_s3 + $0x10] sm:$0xff]  ;;  %v207_v31 = vld [vmem:[%s587_s3 + $0x8] sm:$0xff]  ;;  %v206_v32 = vld [vmem:[%s587_s3] sm:$0xff] }
  0x28   :  { %226 = vmatpush.msrb.mxu0 %v219_v9  ;;  %v264_v33 = vld [vmem:[%s588_s4 + $0x1] ss:$0 sm:$0xff]  ;;  %v265_v37 = vld [vmem:[%s588_s4 + $0x2] ss:$0 sm:$0xff] }
  0x29   :  { %193 = vmatpush.msrb.mxu3 %v174_v63 }
  0x2a   :  { %227 = vmatpush.msrb.mxu0 %v218_v10 }
  0x2b   :  { %194 = vmatpush.msrb.mxu3 %v173_v0 }
  0x2c   :  { %228 = vmatpush.msrb.mxu0 %v217_v11 }
  0x2d   :  { %195 = vmatpush.msrb.mxu3 %v172_v1 }
  0x2e   :  { %229 = vmatpush.msrb.mxu0 %v216_v12 }
  0x2f   :  { %196 = vmatpush.msrb.mxu3 %v171_v2 }
  0x30   :  { %230 = vmatpush.msrb.mxu0 %v215_v13 }
  0x31   :  { %197 = vmatpush.msrb.mxu3 %v170_v3 }
  0x32   :  { %231 = vmatpush.msrb.mxu0 %v214_v14 }
  0x33   :  { %198 = vmatpush.msrb.mxu3 %v169_v4 }
  0x34   :  { %232 = vmatpush.msrb.mxu0 %v213_v15 }
  0x35   :  { %199 = vmatpush.msrb.mxu3 %v168_v5 }
  0x36   :  { %233 = vmatpush.msrb.mxu0 %v212_v17 }
  0x37   :  { %200 = vmatpush.msrb.mxu3 %v167_v6 }
  0x38   :  { %234 = vmatpush.msrb.mxu0 %v211_v18 }
  0x3a   :  { %235 = vmatpush.msrb.mxu0 %v210_v21 }
  0x3c   :  { %236 = vmatpush.msrb.mxu0 %v209_v24 }
  0x3e   :  { %237 = vmatpush.msrb.mxu0 %v208_v30 }
  0x40   :  { %238 = vmatpush.msrb.mxu0 %v207_v31 }
  0x42   :  { %239 = vmatpush.msrb.mxu0 %v206_v32 }
  0x9f   :  { %v103_v19 = vpop.f32.mrf.mxu0  ;;  %v163_v26 = vpop.f32.mrf.mxu3 }
  0xa0   :  { %v104_v20 = vadd.f32 %v263_v16, %v103_v19 }
  0xa1   :  { %v123_v22 = vpop.f32.mrf.mxu1 }
  0xa2   :  { %v124_v23 = vadd.f32 %v123_v22, %v104_v20 }
  0xa5   :  { %v143_v25 = vpop.f32.mrf.mxu2 }
  0xa6   :  { %v144_v27 = vadd.f32 %v143_v25, %v124_v23 }
  0xa8   :  { %v164_v28 = vadd.f32 %v163_v26, %v144_v27 }
  0xaa   :  { %v166_v29 = vmax.f32 %v164_v28, 0.0 }
  0xac   :  { %201 = vmatmul.f32.vlgmr.msrb.gmra.mxu3 %v166_v29 }
 0x12f   :  { %v202_v34 = vpop.f32.mrf.mxu3 }
 0x130   :  { %v203_v35 = vadd.f32 %v264_v33, %v202_v34 }
 0x132   :  { %v205_v36 = vmax.f32 %v203_v35, 0.0 }
 0x134   :  { %240 = vmatmul.f32.vlgmr.msrb.gmra.mxu0 %v205_v36 }
 0x1b1   :  { %v241_v38 = vpop.f32.mrf.mxu0 }
 0x1b2   :  { %v242_v39 = vadd.f32 %v265_v37, %v241_v38 }
 0x1b4   :  { %244 = vst [vmem:[#allocation2] sm:$0x3] %v242_v39 }
 0x1b5   :  { %255 = dma.vmem_to_hbm [thread:$0]  %s251_s8, 32, %s253_s9, [#allocation3]  }
 0x1b6   :  { %290 = dma.done.wait [#allocation3], 32  }
 0x1b7   :  { %291 = vsyncadd [#allocation3], 4294967264 }
 0x1b8   :  { %260 = vsyncpa [#allocation3], 1 }

</bundles_post_ra>
